<compile_context>
chip_gen: v7x
topology: tpu7x:2x2x1
jax: 0.10.0
libtpu: 0.0.40
codegen_flags: <defaults>
</compile_context>

<pallas_src>
import numpy as np
import jax
import jax.numpy as jnp
from jax.experimental import pallas as pl
from jax.experimental.pallas import tpu as pltpu

LANE = 128  # TPU lane width


def _round_up(x, m):
    return (x + m - 1) // m * m


def _cdiv(a, b):
    return (a + b - 1) // b


# ----------------------------------------------------------------------------
# Kernel
# ----------------------------------------------------------------------------
def critic_kernel(state_ref, action_ref,
                  w1_ref, b1_ref,
                  w2h_ref, w2a_ref, b2_ref,
                  w3_ref, b3_ref,
                  out_ref):
    cdt = w1_ref.dtype                      # MXU input dtype (bf16 default / f32)
    x = state_ref[...]                      # (TB, S)        cdt
    a = action_ref[...]                     # (TB, A_pad8)   cdt, zero-padded lanes

    # Layer 0: relu(state @ W1 + b1) — f32 accumulation, f32 elementwise.
    h1 = jnp.dot(x, w1_ref[...], preferred_element_type=jnp.float32) + b1_ref[...]
    h1 = jnp.maximum(h1, 0.0)               # (TB, H0_pad) f32

    # Layer 1 on cat([h1, action]): split into two accumulating dots instead of
    # materializing the concatenated (TB, H0_pad + A_pad8) tile.
    h2 = (jnp.dot(h1.astype(cdt), w2h_ref[...], preferred_element_type=jnp.float32)
          + jnp.dot(a, w2a_ref[...], preferred_element_type=jnp.float32)
          + b2_ref[...])
    h2 = jnp.maximum(h2, 0.0)               # (TB, H1_pad) f32

    # Output layer: tanh(h2 @ W3 + b3).  Narrow (8-lane) f32 store: masked vst
    # is trivially cheap here and the HBM writeback is 16x smaller than a
    # 128-lane f32 slab.
    y = jnp.dot(h2.astype(cdt), w3_ref[...],
                preferred_element_type=jnp.float32) + b3_ref[...]
    out_ref[...] = jnp.tanh(y)              # (TB, OUT_pad) f32


# ----------------------------------------------------------------------------
# Parameter init (mirrors the PyTorch reset_parameters) + kernel-layout prep
# ----------------------------------------------------------------------------
def init_critic_params(key, state_size, action_size, hidden_sizes=(64, 64)):
    """Logical params, stored as [in_features, out_features] (transposed w.r.t.
    PyTorch) so the kernel computes y = x @ W + b.

    PyTorch's `hidden_init` uses fan_in = weight.size()[0] == out_features, so
    hidden weights ~ U(-1/sqrt(out), 1/sqrt(out)); output weights
    ~ U(-3e-3, 3e-3); biases keep the default nn.Linear init
    U(-1/sqrt(in_features), 1/sqrt(in_features)).
    """
    H0, H1 = hidden_sizes
    k = jax.random.split(key, 6)

    def u(kk, shape, lim):
        return jax.random.uniform(kk, shape, jnp.float32, -lim, lim)

    w1 = u(k[0], (state_size, H0), 1.0 / np.sqrt(H0))
    b1 = u(k[1], (H0,), 1.0 / np.sqrt(state_size))

    w2 = u(k[2], (H0 + action_size, H1), 1.0 / np.sqrt(H1))
    b2 = u(k[3], (H1,), 1.0 / np.sqrt(H0 + action_size))

    w3 = u(k[4], (H1, action_size), 3e-3)
    b3 = u(k[5], (action_size,), 1.0 / np.sqrt(H1))

    return {"w1": w1, "b1": b1, "w2": w2, "b2": b2, "w3": w3, "b3": b3}


def prepare_critic_params(params, compute_dtype=jnp.bfloat16):
    """Pad/split weights into the kernel layout and cast MXU inputs.

    Kernel layout:
      w1  : (S, H0_pad)          b1 : (1, H0_pad)   f32
      w2h : (H0_pad, H1_pad)     w2a: (A_pad8, H1_pad)    b2 : (1, H1_pad) f32
      w3  : (H1_pad, OUT_pad)    b3 : (1, OUT_pad)  f32
    with H0_pad = H1_pad = 128 (lane-dense hidden layers), A_pad8 = OUT_pad =
    round_up(action_size, 8).  All pad rows/cols are zero, so relu(0)=tanh(0)=0
    keeps padded lanes exactly zero end-to-end; the wrapper slices them off.

    compute_dtype=bf16 (default) halves weight/activation HBM+VMEM traffic on
    every TPU generation; accumulation and elementwise math stay f32
    (v5e-safe).  Note: inputs are also cast to bf16, so the error includes
    input rounding, not just MXU rounding.
    """
    S, H0 = params["w1"].shape
    H1 = params["w2"].shape[1]
    A = params["w3"].shape[1]

    H0_pad = _round_up(H0, LANE)
    H1_pad = _round_up(H1, LANE)
    A_pad8 = _round_up(A, 8)
    OUT_pad = _round_up(A, 8)
    cdt = compute_dtype

    w1 = jnp.zeros((S, H0_pad), cdt).at[:, :H0].set(params["w1"].astype(cdt))
    b1 = jnp.zeros((1, H0_pad), jnp.float32).at[:, :H0].set(params["b1"].reshape(1, H0))

    w2h = jnp.zeros((H0_pad, H1_pad), cdt).at[:H0, :H1].set(params["w2"][:H0].astype(cdt))
    w2a = jnp.zeros((A_pad8, H1_pad), cdt).at[:A, :H1].set(params["w2"][H0:].astype(cdt))
    b2 = jnp.zeros((1, H1_pad), jnp.float32).at[:, :H1].set(params["b2"].reshape(1, H1))

    w3 = jnp.zeros((H1_pad, OUT_pad), cdt).at[:H1, :A].set(params["w3"].astype(cdt))
    b3 = jnp.zeros((1, OUT_pad), jnp.float32).at[:, :A].set(params["b3"].reshape(1, A))

    return {"w1": w1, "b1": b1, "w2h": w2h, "w2a": w2a, "b2": b2,
            "w3": w3, "b3": b3}


# ----------------------------------------------------------------------------
# Wrapper
# ----------------------------------------------------------------------------
def critic_forward(state, action, kparams, *, tile_b=None, num_tensorcores=1):
    """state: (B, S) f32, action: (B, A) f32, kparams from prepare_critic_params.

    tile_b=None picks a chip-friendly default: one big tile (grid of 1) for
    small/moderate B, split into `num_tensorcores` equal tiles on multi-TC
    chips (v7x: pass num_tensorcores=2), and capped at ~2048 rows per step for
    very large B.  Explicit tile_b is rounded up to a multiple of 8.
    """
    B, S = state.shape
    A = action.shape[1]
    w1, b1 = kparams["w1"], kparams["b1"]
    w2h, w2a, b2 = kparams["w2h"], kparams["w2a"], kparams["b2"]
    w3, b3 = kparams["w3"], kparams["b3"]
    cdt = w1.dtype

    H0_pad = w1.shape[1]
    A_pad8 = w2a.shape[0]
    H1_pad = w2h.shape[1]
    OUT_pad = w3.shape[1]

    # --- batch tiling ---------------------------------------------------------
    B8 = _round_up(B, 8)
    if tile_b is None:
        steps = max(int(num_tensorcores), _cdiv(B8, 2048))
        tile_b = _round_up(_cdiv(B8, steps), 8)
    else:
        tile_b = _round_up(max(8, min(int(tile_b), B8)), 8)
    B_pad = _round_up(B, tile_b)
    grid = (B_pad // tile_b,)

    # --- input staging (cast to compute dtype; pad batch / 8-lane action) ----
    state_c = state.astype(cdt)
    if B_pad != B:
        state_c = jnp.zeros((B_pad, S), cdt).at[:B].set(state_c)
    if B_pad != B or A_pad8 != A:
        action_c = jnp.zeros((B_pad, A_pad8), cdt).at[:B, :A].set(action.astype(cdt))
    else:
        action_c = action.astype(cdt)

    # --- cost hint ------------------------------------------------------------
    itm = jnp.dtype(cdt).itemsize
    flops = 2 * B_pad * (S * H0_pad + H0_pad * H1_pad + A_pad8 * H1_pad
                         + H1_pad * OUT_pad)
    bytes_accessed = (B_pad * (S + A_pad8) * itm          # activations in
                      + B_pad * OUT_pad * 4               # output (narrow, f32)
                      + (w1.size + w2h.size + w2a.size + w3.size) * itm
                      + (b1.size + b2.size + b3.size) * 4)
    cost = pl.CostEstimate(flops=int(flops),
                           transcendentals=int(B_pad * OUT_pad),  # tanh
                           bytes_accessed=int(bytes_accessed))

    # Weights/biases use a constant index_map -> resident in VMEM across grid
    # steps (no re-DMA).  Footprint is ~2*tile_b*(S+A_pad8)*itm input +
    # 2*tile_b*OUT_pad*4 output + <100 KiB weights: no vmem_limit_bytes needed
    # at these tile sizes on any generation (v7x included).
    out = pl.pallas_call(
        critic_kernel,
        out_shape=jax.ShapeDtypeStruct((B_pad, OUT_pad), jnp.float32),
        grid=grid,
        in_specs=[
            pl.BlockSpec((tile_b, S), lambda i: (i, 0)),        # state
            pl.BlockSpec((tile_b, A_pad8), lambda i: (i, 0)),   # action (8 lanes)
            pl.BlockSpec((S, H0_pad), lambda i: (0, 0)),        # w1
            pl.BlockSpec((1, H0_pad), lambda i: (0, 0)),        # b1
            pl.BlockSpec((H0_pad, H1_pad), lambda i: (0, 0)),   # w2 (h1 rows)
            pl.BlockSpec((A_pad8, H1_pad), lambda i: (0, 0)),   # w2 (action rows)
            pl.BlockSpec((1, H1_pad), lambda i: (0, 0)),        # b2
            pl.BlockSpec((H1_pad, OUT_pad), lambda i: (0, 0)),  # w3
            pl.BlockSpec((1, OUT_pad), lambda i: (0, 0)),       # b3
        ],
        out_specs=pl.BlockSpec((tile_b, OUT_pad), lambda i: (i, 0)),
        compiler_params=pltpu.CompilerParams(
            dimension_semantics=("parallel",)),                 # v7x: 2 TCs split batch
        cost_estimate=cost,
    )(state_c, action_c, w1, b1, w2h, w2a, b2, w3, b3)

    return out[:B, :A]


# ----------------------------------------------------------------------------
# Pure-JAX reference (matches PyTorch forward semantics)
# ----------------------------------------------------------------------------
def critic_reference(state, action, p):
    h1 = jax.nn.relu(state @ p["w1"] + p["b1"])
    x = jnp.concatenate([h1, action], axis=1)
    h2 = jax.nn.relu(x @ p["w2"] + p["b2"])
    return jnp.tanh(h2 @ p["w3"] + p["b3"])


if __name__ == "__main__":
    state_size, action_size = 16, 4
    hidden_sizes = (64, 64)
    batch = 512

    key = jax.random.PRNGKey(0)
    k_params, k_state, k_action = jax.random.split(key, 3)

    params = init_critic_params(k_params, state_size, action_size, hidden_sizes)
    state = jax.random.normal(k_state, (batch, state_size), jnp.float32)
    action = jax.random.normal(k_action, (batch, action_size), jnp.float32)

    ref = critic_reference(state, action, params)

    # f32 MXU path: exact match vs reference; single big tile (grid of 1).
    kp_f32 = prepare_critic_params(params, compute_dtype=jnp.float32)
    out_f32 = jax.block_until_ready(critic_forward(state, action, kp_f32))
    np.testing.assert_allclose(np.asarray(out_f32), np.asarray(ref),
                               rtol=1e-5, atol=1e-5)

    # bf16 MXU path (the default): f32 accumulation + f32 elementwise.
    kp_bf16 = prepare_critic_params(params)
    out_bf16 = jax.block_until_ready(critic_forward(state, action, kp_bf16))
    np.testing.assert_allclose(np.asarray(out_bf16), np.asarray(ref),
                               rtol=5e-2, atol=5e-2)

    # Multi-step grid (v7x-style 2-TC batch split) — exercises grid > 1.
    out_2tc = jax.block_until_ready(
        critic_forward(state, action, kp_f32, num_tensorcores=2))
    np.testing.assert_allclose(np.asarray(out_2tc), np.asarray(ref),
                               rtol=1e-5, atol=1e-5)

    # Odd batch — exercises batch/action padding paths.
    b_odd = 100
    ref_odd = critic_reference(state[:b_odd], action[:b_odd], params)
    out_odd = jax.block_until_ready(
        critic_forward(state[:b_odd], action[:b_odd], kp_f32))
    np.testing.assert_allclose(np.asarray(out_odd), np.asarray(ref_odd),
                               rtol=1e-5, atol=1e-5)

    print("KERNEL_OK")
</pallas_src>

<mosaic_0001>
module attributes {stable_mosaic.version = 11 : i64} {
  func.func @critic_kernel(%arg0: i32, %arg1: memref<512x16xf32, #tpu.memory_space<vmem>>, %arg2: memref<512x8xf32, #tpu.memory_space<vmem>>, %arg3: memref<16x128xf32, #tpu.memory_space<vmem>>, %arg4: memref<1x128xf32, #tpu.memory_space<vmem>>, %arg5: memref<128x128xf32, #tpu.memory_space<vmem>>, %arg6: memref<8x128xf32, #tpu.memory_space<vmem>>, %arg7: memref<1x128xf32, #tpu.memory_space<vmem>>, %arg8: memref<128x8xf32, #tpu.memory_space<vmem>>, %arg9: memref<1x8xf32, #tpu.memory_space<vmem>>, %arg10: memref<512x8xf32, #tpu.memory_space<vmem>>) attributes {dimension_semantics = [#tpu.dimension_semantics<parallel>], iteration_bounds = array<i64: 1>, scalar_prefetch = 0 : i64, scratch_operands = 0 : i64, tpu.core_type = #tpu.core_type<tc>, window_params = [{transform_indices = @transform_0, window_bounds = array<i64: 512, 16>}, {transform_indices = @transform_1, window_bounds = array<i64: 512, 8>}, {pipeline_mode = #tpu.pipeline_mode<synchronous>, transform_indices = @transform_2, window_bounds = array<i64: 16, 128>}, {pipeline_mode = #tpu.pipeline_mode<synchronous>, transform_indices = @transform_3, window_bounds = array<i64: 1, 128>}, {pipeline_mode = #tpu.pipeline_mode<synchronous>, transform_indices = @transform_4, window_bounds = array<i64: 128, 128>}, {pipeline_mode = #tpu.pipeline_mode<synchronous>, transform_indices = @transform_5, window_bounds = array<i64: 8, 128>}, {pipeline_mode = #tpu.pipeline_mode<synchronous>, transform_indices = @transform_6, window_bounds = array<i64: 1, 128>}, {pipeline_mode = #tpu.pipeline_mode<synchronous>, transform_indices = @transform_7, window_bounds = array<i64: 128, 8>}, {pipeline_mode = #tpu.pipeline_mode<synchronous>, transform_indices = @transform_8, window_bounds = array<i64: 1, 8>}, {transform_indices = @transform_9, window_bounds = array<i64: 512, 8>}]} {
    %c0 = arith.constant 0 : index
    %c0_0 = arith.constant 0 : index
    %0 = vector.load %arg1[%c0, %c0_0] : memref<512x16xf32, #tpu.memory_space<vmem>>, vector<512x16xf32>
    %c0_1 = arith.constant 0 : index
    %c0_2 = arith.constant 0 : index
    %1 = vector.load %arg2[%c0_1, %c0_2] : memref<512x8xf32, #tpu.memory_space<vmem>>, vector<512x8xf32>
    %c0_3 = arith.constant 0 : index
    %c0_4 = arith.constant 0 : index
    %2 = vector.load %arg3[%c0_3, %c0_4] : memref<16x128xf32, #tpu.memory_space<vmem>>, vector<16x128xf32>
    %cst = arith.constant dense<0.000000e+00> : vector<512x128xf32>
    %3 = tpu.matmul %0, %2, %cst {dimension_numbers = #tpu.dot_dimension_numbers<[1], [0], [0], [1], [0, 0, 1, 1], [], []>} : vector<512x16xf32>, vector<16x128xf32>, vector<512x128xf32> -> vector<512x128xf32>
    %c0_5 = arith.constant 0 : index
    %c0_6 = arith.constant 0 : index
    %4 = vector.load %arg4[%c0_5, %c0_6] : memref<1x128xf32, #tpu.memory_space<vmem>>, vector<1x128xf32>
    %5 = vector.broadcast %4 : vector<1x128xf32> to vector<512x128xf32>
    %6 = arith.addf %3, %5 : vector<512x128xf32>
    %cst_7 = arith.constant 0.000000e+00 : f32
    %7 = vector.broadcast %cst_7 : f32 to vector<512x128xf32>
    %8 = arith.maximumf %6, %7 : vector<512x128xf32>
    %c0_8 = arith.constant 0 : index
    %c0_9 = arith.constant 0 : index
    %9 = vector.load %arg5[%c0_8, %c0_9] : memref<128x128xf32, #tpu.memory_space<vmem>>, vector<128x128xf32>
    %cst_10 = arith.constant dense<0.000000e+00> : vector<512x128xf32>
    %10 = tpu.matmul %8, %9, %cst_10 {dimension_numbers = #tpu.dot_dimension_numbers<[1], [0], [0], [1], [0, 0, 1, 1], [], []>} : vector<512x128xf32>, vector<128x128xf32>, vector<512x128xf32> -> vector<512x128xf32>
    %c0_11 = arith.constant 0 : index
    %c0_12 = arith.constant 0 : index
    %11 = vector.load %arg6[%c0_11, %c0_12] : memref<8x128xf32, #tpu.memory_space<vmem>>, vector<8x128xf32>
    %cst_13 = arith.constant dense<0.000000e+00> : vector<512x128xf32>
    %12 = tpu.matmul %1, %11, %cst_13 {dimension_numbers = #tpu.dot_dimension_numbers<[1], [0], [0], [1], [0, 0, 1, 1], [], []>} : vector<512x8xf32>, vector<8x128xf32>, vector<512x128xf32> -> vector<512x128xf32>
    %13 = arith.addf %10, %12 : vector<512x128xf32>
    %c0_14 = arith.constant 0 : index
    %c0_15 = arith.constant 0 : index
    %14 = vector.load %arg7[%c0_14, %c0_15] : memref<1x128xf32, #tpu.memory_space<vmem>>, vector<1x128xf32>
    %15 = vector.broadcast %14 : vector<1x128xf32> to vector<512x128xf32>
    %16 = arith.addf %13, %15 : vector<512x128xf32>
    %cst_16 = arith.constant 0.000000e+00 : f32
    %17 = vector.broadcast %cst_16 : f32 to vector<512x128xf32>
    %18 = arith.maximumf %16, %17 : vector<512x128xf32>
    %c0_17 = arith.constant 0 : index
    %c0_18 = arith.constant 0 : index
    %19 = vector.load %arg8[%c0_17, %c0_18] : memref<128x8xf32, #tpu.memory_space<vmem>>, vector<128x8xf32>
    %cst_19 = arith.constant dense<0.000000e+00> : vector<512x8xf32>
    %20 = tpu.matmul %18, %19, %cst_19 {dimension_numbers = #tpu.dot_dimension_numbers<[1], [0], [0], [1], [0, 0, 1, 1], [], []>} : vector<512x128xf32>, vector<128x8xf32>, vector<512x8xf32> -> vector<512x8xf32>
    %c0_20 = arith.constant 0 : index
    %c0_21 = arith.constant 0 : index
    %21 = vector.load %arg9[%c0_20, %c0_21] : memref<1x8xf32, #tpu.memory_space<vmem>>, vector<1x8xf32>
    %22 = vector.broadcast %21 : vector<1x8xf32> to vector<512x8xf32>
    %23 = arith.addf %20, %22 : vector<512x8xf32>
    %24 = math.tanh %23 : vector<512x8xf32>
    %c0_22 = arith.constant 0 : index
    %c0_23 = arith.constant 0 : index
    %25 = vector.load %arg10[%c0_22, %c0_23] : memref<512x8xf32, #tpu.memory_space<vmem>>, vector<512x8xf32>
    tpu.vector_store %arg10[%c0_22, %c0_23], %24 {strides = array<i32>} : memref<512x8xf32, #tpu.memory_space<vmem>>, vector<512x8xf32>,
    return
  }
  func.func @transform_0(%arg0: i32) -> (i32, i32) {
    %c0_i32 = arith.constant 0 : i32
    %c0_i32_0 = arith.constant 0 : i32
    return %arg0, %c0_i32 : i32, i32
  }
  func.func @transform_1(%arg0: i32) -> (i32, i32) {
    %c0_i32 = arith.constant 0 : i32
    %c0_i32_0 = arith.constant 0 : i32
    return %arg0, %c0_i32 : i32, i32
  }
  func.func @transform_2(%arg0: i32) -> (i32, i32) {
    %c0_i32 = arith.constant 0 : i32
    %c0_i32_0 = arith.constant 0 : i32
    %c0_i32_1 = arith.constant 0 : i32
    return %c0_i32, %c0_i32_0 : i32, i32
  }
  func.func @transform_3(%arg0: i32) -> (i32, i32) {
    %c0_i32 = arith.constant 0 : i32
    %c0_i32_0 = arith.constant 0 : i32
    %c0_i32_1 = arith.constant 0 : i32
    return %c0_i32, %c0_i32_0 : i32, i32
  }
  func.func @transform_4(%arg0: i32) -> (i32, i32) {
    %c0_i32 = arith.constant 0 : i32
    %c0_i32_0 = arith.constant 0 : i32
    %c0_i32_1 = arith.constant 0 : i32
    return %c0_i32, %c0_i32_0 : i32, i32
  }
  func.func @transform_5(%arg0: i32) -> (i32, i32) {
    %c0_i32 = arith.constant 0 : i32
    %c0_i32_0 = arith.constant 0 : i32
    %c0_i32_1 = arith.constant 0 : i32
    return %c0_i32, %c0_i32_0 : i32, i32
  }
  func.func @transform_6(%arg0: i32) -> (i32, i32) {
    %c0_i32 = arith.constant 0 : i32
    %c0_i32_0 = arith.constant 0 : i32
    %c0_i32_1 = arith.constant 0 : i32
    return %c0_i32, %c0_i32_0 : i32, i32
  }
  func.func @transform_7(%arg0: i32) -> (i32, i32) {
    %c0_i32 = arith.constant 0 : i32
    %c0_i32_0 = arith.constant 0 : i32
    %c0_i32_1 = arith.constant 0 : i32
    return %c0_i32, %c0_i32_0 : i32, i32
  }
  func.func @transform_8(%arg0: i32) -> (i32, i32) {
    %c0_i32 = arith.constant 0 : i32
    %c0_i32_0 = arith.constant 0 : i32
    %c0_i32_1 = arith.constant 0 : i32
    return %c0_i32, %c0_i32_0 : i32, i32
  }
  func.func @transform_9(%arg0: i32) -> (i32, i32) {
    %c0_i32 = arith.constant 0 : i32
    %c0_i32_0 = arith.constant 0 : i32
    return %arg0, %c0_i32 : i32, i32
  }
}

</mosaic_0001>

<bundles_post_ra>
// kernel: tpu_custom_call.1
= control target key start
LH: loop header
LB: loop body
LE: loop exit
PB: predicated region body
PF: predicated region fallthrough
CT: control target
= control target key end

     0   :  { %vm169_vm0 = vcmask 130048   ;;  %vm828_vm1 = vcmask 64512   ;;  %s4732_s2 = inlined_call_operand.vmem [shape: f32[16,128], index: 2, kind: input, shape index: {}]   ;;  %s4733_s0 = inlined_call_operand.vmem [shape: f32[512,16], index: 0, kind: input, shape index: {}]   ;;  %s4734_s5 = inlined_call_operand.vmem [shape: f32[8,128], index: 5, kind: input, shape index: {}]   ;;  %s4735_s1 = inlined_call_operand.vmem [shape: f32[512,8], index: 1, kind: input, shape index: {}]   ;;  %s4736_s4 = inlined_call_operand.vmem [shape: f32[128,128], index: 4, kind: input, shape index: {}]   ;;  %s4737_s7 = inlined_call_operand.vmem [shape: f32[128,8], index: 7, kind: input, shape index: {}]   ;;  %s4738_s3 = inlined_call_operand.vmem [shape: f32[1,128], index: 3, kind: input, shape index: {}]   ;;  %s4739_s6 = inlined_call_operand.vmem [shape: f32[1,128], index: 6, kind: input, shape index: {}]   ;;  %s4740_s8 = inlined_call_operand.vmem [shape: f32[1,8], index: 8, kind: input, shape index: {}]   ;;  %s4741_s9 = inlined_call_operand.vmem [shape: f32[512,8], index: 9, kind: output, shape index: {}]  }
   0x1   :  { %v160_v0 = vld [vmem:[%s4732_s2] sm:$0xff]  ;;  %v161_v1 = vld [vmem:[%s4732_s2 + $0x8] sm:$0xff]  ;;  %v34_v5 = vld [vmem:[%s4733_s0 + $0x10] sm:$0xff] }
   0x2   :  { %v32_v2 = vld [vmem:[%s4733_s0] sm:$0xff]  ;;  %v3342_v3 = vpack.c.bf16 %v161_v1, %v160_v0  ;;  %v33_v4 = vld [vmem:[%s4733_s0 + $0x8] sm:$0xff]  ;;  %v35_v6 = vld [vmem:[%s4733_s0 + $0x18] sm:$0xff] }
   0x3   :  { %2892 = vmatprep.mubr.msk.f32.mxu0 %vm169_vm0, %v32_v2  ;;  %v36_v7 = vld [vmem:[%s4733_s0 + $0x20] sm:$0xff]  ;;  %v37_v8 = vld [vmem:[%s4733_s0 + $0x28] sm:$0xff]  ;;  %v38_v9 = vld [vmem:[%s4733_s0 + $0x30] sm:$0xff] }
   0x4   :  { %3343 = vmatprep.subr.bf16.mxu0 %v3342_v3  ;;  %v827_v10 = vld [vmem:[%s4734_s5] sm:$0xff]  ;;  %v39_v11 = vld [vmem:[%s4733_s0 + $0x38] sm:$0xff]  ;;  %v812_v15 = vld [vmem:[%s4736_s4 + $0x8] sm:$0xff] }
   0x5   :  { %3345 = vmatpush3.bf16.msra.mxu0 %v3342_v3  ;;  %2988 = vmatprep.subr.mxu1 %v827_v10  ;;  %v96_v12 = vld [vmem:[%s4735_s1] sm:$0xff]  ;;  %v97_v16 = vld [vmem:[%s4735_s1 + $0x8] sm:$0xff]  ;;  %v98_v18 = vld [vmem:[%s4735_s1 + $0x10] sm:$0xff] }
   0x6   :  { %v811_v13 = vld [vmem:[%s4736_s4] sm:$0xff]  ;;  %2989 = vmatpush3.msra.mxu1 %v827_v10  ;;  %2990 = vmatprep.mubr.msk.f32.mxu1 %vm828_vm1, %v96_v12  ;;  %v99_v19 = vld [vmem:[%s4735_s1 + $0x18] sm:$0xff]  ;;  %v41_v20 = vld [vmem:[%s4733_s0 + $0x48] sm:$0xff] }
   0x7   :  { %v40_v14 = vld [vmem:[%s4733_s0 + $0x40] sm:$0xff]  ;;  %v3346_v17 = vpack.c.bf16 %v812_v15, %v811_v13  ;;  %2991 = vmatmul.mubr.msk.f32.vlgmr.msra.gmra.mrb[0].mxu1 %vm828_vm1, %v97_v16  ;;  %v42_v22 = vld [vmem:[%s4733_s0 + $0x50] sm:$0xff]  ;;  %v101_v24 = vld [vmem:[%s4735_s1 + $0x28] sm:$0xff] }
   0x8   :  { %2893 = vmatmul.mubr.msk.f32.vlgmr.msra.gmra.mrb[0].mxu0 %vm169_vm0, %v33_v4  ;;  %2993 = vmatprep.mubr.msk.f32.mxu1 %vm828_vm1, %v98_v18  ;;  %v100_v21 = vld [vmem:[%s4735_s1 + $0x20] sm:$0xff]  ;;  %v813_v23 = vld [vmem:[%s4736_s4 + $0x10] sm:$0xff]  ;;  %v814_v25 = vld [vmem:[%s4736_s4 + $0x18] sm:$0xff] }
   0x9   :  { %2895 = vmatprep.mubr.msk.f32.mxu0 %vm169_vm0, %v34_v5  ;;  %3347 = vmatprep.subr.bf16.mxu1 %v3346_v17  ;;  %v43_v26 = vld [vmem:[%s4733_s0 + $0x58] sm:$0xff]  ;;  %v102_v27 = vld [vmem:[%s4735_s1 + $0x30] sm:$0xff]  ;;  %v3350_v28 = vpack.c.bf16 %v814_v25, %v813_v23  ;;  %v44_v29 = vld [vmem:[%s4733_s0 + $0x60] sm:$0xff] }
   0xa   :  { %3349 = vmatpush3.bf16.msra.mxu1 %v3346_v17  ;;  %v103_v30 = vld [vmem:[%s4735_s1 + $0x38] sm:$0xff]  ;;  %v45_v31 = vld [vmem:[%s4733_s0 + $0x68] sm:$0xff]  ;;  %v104_v32 = vld [vmem:[%s4735_s1 + $0x40] sm:$0xff] }
   0xb   :  { %2994 = vmatmul.mubr.msk.f32.gmra.mrb[2].mxu1 %vm828_vm1, %v99_v19  ;;  %3351 = vmatprep.subr.bf16.mxu1 %v3350_v28  ;;  %v815_v33 = vld [vmem:[%s4736_s4 + $0x20] sm:$0xff]  ;;  %v46_v34 = vld [vmem:[%s4733_s0 + $0x70] sm:$0xff]  ;;  %v816_v35 = vld [vmem:[%s4736_s4 + $0x28] sm:$0xff] }
   0xc   :  { %2896 = vmatmul.mubr.msk.f32.gmra.mrb[2].mxu0 %vm169_vm0, %v35_v6  ;;  %2996 = vmatprep.mubr.msk.f32.mxu1 %vm828_vm1, %v100_v21  ;;  %v3354_v36 = vpack.c.bf16 %v816_v35, %v815_v33  ;;  %v105_v37 = vld [vmem:[%s4735_s1 + $0x48] sm:$0xff]  ;;  %v47_v38 = vld [vmem:[%s4733_s0 + $0x78] sm:$0xff]  ;;  %v106_v39 = vld [vmem:[%s4735_s1 + $0x50] sm:$0xff] }
   0xd   :  { %2898 = vmatprep.mubr.msk.f32.mxu0 %vm169_vm0, %v36_v7  ;;  %v817_v40 = vld [vmem:[%s4736_s4 + $0x30] sm:$0xff]  ;;  %v48_v41 = vld [vmem:[%s4733_s0 + $0x80] sm:$0xff]  ;;  %v818_v42 = vld [vmem:[%s4736_s4 + $0x38] sm:$0xff] }
   0xe   :  { %3353 = vmatpush3.bf16.msra.mxu1 %v3350_v28  ;;  %v3358_v43 = vpack.c.bf16 %v818_v42, %v817_v40  ;;  %v49_v44 = vld [vmem:[%s4733_s0 + $0x88] sm:$0xff]  ;;  %v107_v45 = vld [vmem:[%s4735_s1 + $0x58] sm:$0xff]  ;;  %v108_v46 = vld [vmem:[%s4735_s1 + $0x60] sm:$0xff] }
   0xf   :  { %2997 = vmatmul.mubr.msk.f32.gmra.mrb[4].mxu1 %vm828_vm1, %v101_v24  ;;  %3355 = vmatprep.subr.bf16.mxu1 %v3354_v36  ;;  %v819_v47 = vld [vmem:[%s4736_s4 + $0x40] sm:$0xff]  ;;  %v820_v48 = vld [vmem:[%s4736_s4 + $0x48] sm:$0xff]  ;;  %v50_v49 = vld [vmem:[%s4733_s0 + $0x90] sm:$0xff] }
  0x10   :  { %2899 = vmatmul.mubr.msk.f32.gmra.mrb[4].mxu0 %vm169_vm0, %v37_v8  ;;  %2999 = vmatprep.mubr.msk.f32.mxu1 %vm828_vm1, %v102_v27  ;;  %v3362_v50 = vpack.c.bf16 %v820_v48, %v819_v47  ;;  %v109_v51 = vld [vmem:[%s4735_s1 + $0x68] sm:$0xff]  ;;  %v821_v52 = vld [vmem:[%s4736_s4 + $0x50] sm:$0xff]  ;;  %v822_v53 = vld [vmem:[%s4736_s4 + $0x58] sm:$0xff] }
  0x11   :  { %2901 = vmatprep.mubr.msk.f32.mxu0 %vm169_vm0, %v38_v9  ;;  %v51_v54 = vld [vmem:[%s4733_s0 + $0x98] sm:$0xff]  ;;  %v110_v55 = vld [vmem:[%s4735_s1 + $0x70] sm:$0xff]  ;;  %v3366_v56 = vpack.c.bf16 %v822_v53, %v821_v52  ;;  %v52_v57 = vld [vmem:[%s4733_s0 + $0xa0] sm:$0xff] }
  0x12   :  { %3357 = vmatpush3.bf16.msra.mxu1 %v3354_v36  ;;  %v823_v58 = vld [vmem:[%s4736_s4 + $0x60] sm:$0xff]  ;;  %v111_v59 = vld [vmem:[%s4735_s1 + $0x78] sm:$0xff]  ;;  %v824_v60 = vld [vmem:[%s4736_s4 + $0x68] sm:$0xff] }
  0x13   :  { %3000 = vmatmul.mubr.msk.f32.gmra.mrb[6].mxu1 %vm828_vm1, %v103_v30  ;;  %3359 = vmatprep.subr.bf16.mxu1 %v3358_v43  ;;  %v53_v61 = vld [vmem:[%s4733_s0 + $0xa8] sm:$0xff]  ;;  %v112_v62 = vld [vmem:[%s4735_s1 + $0x80] sm:$0xff]  ;;  %v3370_v63 = vpack.c.bf16 %v824_v60, %v823_v58  ;;  %v54_v0 = vld [vmem:[%s4733_s0 + $0xb0] sm:$0xff] }
  0x14   :  { %2902 = vmatmul.mubr.msk.f32.gmra.mrb[6].mxu0 %vm169_vm0, %v39_v11  ;;  %3002 = vmatprep.mubr.msk.f32.mxu1 %vm828_vm1, %v104_v32  ;;  %v825_v1 = vld [vmem:[%s4736_s4 + $0x70] sm:$0xff]  ;;  %v826_v2 = vld [vmem:[%s4736_s4 + $0x78] sm:$0xff]  ;;  %v113_v3 = vld [vmem:[%s4735_s1 + $0x88] sm:$0xff] }
  0x15   :  { %2904 = vmatprep.mubr.msk.f32.mxu0 %vm169_vm0, %v40_v14  ;;  %v3374_v4 = vpack.c.bf16 %v826_v2, %v825_v1  ;;  %v55_v5 = vld [vmem:[%s4733_s0 + $0xb8] sm:$0xff]  ;;  %v114_v6 = vld [vmem:[%s4735_s1 + $0x90] sm:$0xff]  ;;  %v56_v7 = vld [vmem:[%s4733_s0 + $0xc0] sm:$0xff] }
  0x16   :  { %3361 = vmatpush3.bf16.msra.mxu1 %v3358_v43  ;;  %v115_v8 = vld [vmem:[%s4735_s1 + $0x98] sm:$0xff]  ;;  %v57_v9 = vld [vmem:[%s4733_s0 + $0xc8] sm:$0xff]  ;;  %v116_v10 = vld [vmem:[%s4735_s1 + $0xa0] sm:$0xff] }
  0x17   :  { %3003 = vmatmul.mubr.msk.f32.gmra.mrb[8].mxu1 %vm828_vm1, %v105_v37  ;;  %3363 = vmatprep.subr.bf16.mxu1 %v3362_v50  ;;  %v58_v11 = vld [vmem:[%s4733_s0 + $0xd0] sm:$0xff]  ;;  %v117_v12 = vld [vmem:[%s4735_s1 + $0xa8] sm:$0xff]  ;;  %v59_v13 = vld [vmem:[%s4733_s0 + $0xd8] sm:$0xff] }
  0x18   :  { %2905 = vmatmul.mubr.msk.f32.gmra.mrb[8].mxu0 %vm169_vm0, %v41_v20  ;;  %3005 = vmatprep.mubr.msk.f32.mxu1 %vm828_vm1, %v106_v39  ;;  %v118_v14 = vld [vmem:[%s4735_s1 + $0xb0] sm:$0xff]  ;;  %v60_v15 = vld [vmem:[%s4733_s0 + $0xe0] sm:$0xff]  ;;  %v119_v16 = vld [vmem:[%s4735_s1 + $0xb8] sm:$0xff] }
  0x19   :  { %2907 = vmatprep.mubr.msk.f32.mxu0 %vm169_vm0, %v42_v22  ;;  %v61_v17 = vld [vmem:[%s4733_s0 + $0xe8] sm:$0xff]  ;;  %v120_v18 = vld [vmem:[%s4735_s1 + $0xc0] sm:$0xff]  ;;  %v62_v19 = vld [vmem:[%s4733_s0 + $0xf0] sm:$0xff] }
  0x1a   :  { %3365 = vmatpush3.bf16.msra.mxu1 %v3362_v50  ;;  %v121_v20 = vld [vmem:[%s4735_s1 + $0xc8] sm:$0xff]  ;;  %v63_v21 = vld [vmem:[%s4733_s0 + $0xf8] sm:$0xff]  ;;  %v122_v22 = vld [vmem:[%s4735_s1 + $0xd0] sm:$0xff] }
  0x1b   :  { %3006 = vmatmul.mubr.msk.f32.gmra.mrb[10].mxu1 %vm828_vm1, %v107_v45  ;;  %3367 = vmatprep.subr.bf16.mxu1 %v3366_v56  ;;  %v64_v23 = vld [vmem:[%s4733_s0 + $0x100] sm:$0xff]  ;;  %v123_v24 = vld [vmem:[%s4735_s1 + $0xd8] sm:$0xff]  ;;  %v65_v25 = vld [vmem:[%s4733_s0 + $0x108] sm:$0xff] }
  0x1c   :  { %2908 = vmatmul.mubr.msk.f32.gmra.mrb[10].mxu0 %vm169_vm0, %v43_v26  ;;  %3008 = vmatprep.mubr.msk.f32.mxu1 %vm828_vm1, %v108_v46  ;;  %v124_v26 = vld [vmem:[%s4735_s1 + $0xe0] sm:$0xff]  ;;  %v66_v27 = vld [vmem:[%s4733_s0 + $0x110] sm:$0xff]  ;;  %v125_v28 = vld [vmem:[%s4735_s1 + $0xe8] sm:$0xff] }
  0x1d   :  { %2910 = vmatprep.mubr.msk.f32.mxu0 %vm169_vm0, %v44_v29  ;;  %v67_v29 = vld [vmem:[%s4733_s0 + $0x118] sm:$0xff]  ;;  %v126_v30 = vld [vmem:[%s4735_s1 + $0xf0] sm:$0xff]  ;;  %v69_v33 = vld [vmem:[%s4733_s0 + $0x128] sm:$0xff] }
  0x1e   :  { %3369 = vmatpush3.bf16.msra.mxu1 %v3366_v56  ;;  %v127_v32 = vld [vmem:[%s4735_s1 + $0xf8] sm:$0xff]  ;;  %v70_v35 = vld [vmem:[%s4733_s0 + $0x130] sm:$0xff]  ;;  %v129_v36 = vld [vmem:[%s4735_s1 + $0x108] sm:$0xff] }
  0x1f   :  { %3009 = vmatmul.mubr.msk.f32.gmra.mrb[12].mxu1 %vm828_vm1, %v109_v51  ;;  %3371 = vmatprep.subr.bf16.mxu1 %v3370_v63  ;;  %v71_v37 = vld [vmem:[%s4733_s0 + $0x138] sm:$0xff]  ;;  %v72_v39 = vld [vmem:[%s4733_s0 + $0x140] sm:$0xff]  ;;  %v74_v43 = vld [vmem:[%s4733_s0 + $0x150] sm:$0xff] }
  0x20   :  { %2911 = vmatmul.mubr.msk.f32.gmra.mrb[12].mxu0 %vm169_vm0, %v45_v31  ;;  %3011 = vmatprep.mubr.msk.f32.mxu1 %vm828_vm1, %v110_v55  ;;  %v68_v31 = vld [vmem:[%s4733_s0 + $0x120] sm:$0xff]  ;;  %v131_v40 = vld [vmem:[%s4735_s1 + $0x118] sm:$0xff]  ;;  %v134_v46 = vld [vmem:[%s4735_s1 + $0x130] sm:$0xff] }
  0x21   :  { %2913 = vmatprep.mubr.msk.f32.mxu0 %vm169_vm0, %v46_v34  ;;  %v128_v34 = vld [vmem:[%s4735_s1 + $0x100] sm:$0xff]  ;;  %v75_v45 = vld [vmem:[%s4733_s0 + $0x158] sm:$0xff]  ;;  %v78_v51 = vld [vmem:[%s4733_s0 + $0x170] sm:$0xff] }
  0x22   :  { %3373 = vmatpush3.bf16.msra.mxu1 %v3370_v63  ;;  %v132_v42 = vld [vmem:[%s4735_s1 + $0x120] sm:$0xff]  ;;  %v135_v48 = vld [vmem:[%s4735_s1 + $0x138] sm:$0xff]  ;;  %v137_v52 = vld [vmem:[%s4735_s1 + $0x148] sm:$0xff] }
  0x23   :  { %3012 = vmatmul.mubr.msk.f32.gmra.mrb[14].mxu1 %vm828_vm1, %v111_v59  ;;  %3375 = vmatprep.subr.bf16.mxu1 %v3374_v4  ;;  %v76_v47 = vld [vmem:[%s4733_s0 + $0x160] sm:$0xff]  ;;  %v79_v53 = vld [vmem:[%s4733_s0 + $0x178] sm:$0xff]  ;;  %v82_v59 = vld [vmem:[%s4733_s0 + $0x190] sm:$0xff] }
  0x24   :  { %2914 = vmatmul.mubr.msk.f32.gmra.mrb[14].mxu0 %vm169_vm0, %v47_v38  ;;  %3014 = vmatprep.mubr.msk.f32.mxu1 %vm828_vm1, %v112_v62  ;;  %v130_v38 = vld [vmem:[%s4735_s1 + $0x110] sm:$0xff]  ;;  %v136_v50 = vld [vmem:[%s4735_s1 + $0x140] sm:$0xff]  ;;  %v139_v56 = vld [vmem:[%s4735_s1 + $0x158] sm:$0xff] }
  0x25   :  { %2916 = vmatprep.mubr.msk.f32.mxu0 %vm169_vm0, %v48_v41  ;;  %v73_v41 = vld [vmem:[%s4733_s0 + $0x148] sm:$0xff]  ;;  %v80_v55 = vld [vmem:[%s4733_s0 + $0x180] sm:$0xff]  ;;  %v142_v62 = vld [vmem:[%s4735_s1 + $0x170] sm:$0xff] }
  0x26   :  { %3377 = vmatpush3.bf16.msra.mxu1 %v3374_v4  ;;  %v140_v58 = vld [vmem:[%s4735_s1 + $0x160] sm:$0xff]  ;;  %v141_v60 = vld [vmem:[%s4735_s1 + $0x168] sm:$0xff] }
  0x27   :  { %3015 = vmatmul.mubr.msk.f32.gmra.mrb[16].mxu1 %vm828_vm1, %v113_v3  ;;  %v84_v63 = vld [vmem:[%s4733_s0 + $0x1a0] sm:$0xff]  ;;  %v85_v1 = vld [vmem:[%s4733_s0 + $0x1a8] sm:$0xff]  ;;  %v86_v3 = vld [vmem:[%s4733_s0 + $0x1b0] sm:$0xff] }
  0x28   :  { %2917 = vmatmul.mubr.msk.f32.gmra.mrb[16].mxu0 %vm169_vm0, %v49_v44  ;;  %3017 = vmatprep.mubr.msk.f32.mxu1 %vm828_vm1, %v114_v6  ;;  %v133_v44 = vld [vmem:[%s4735_s1 + $0x128] sm:$0xff]  ;;  %v144_v2 = vld [vmem:[%s4735_s1 + $0x180] sm:$0xff]  ;;  %v146_v6 = vld [vmem:[%s4735_s1 + $0x190] sm:$0xff] }
  0x29   :  { %2919 = vmatprep.mubr.msk.f32.mxu0 %vm169_vm0, %v50_v49  ;;  %v77_v49 = vld [vmem:[%s4733_s0 + $0x168] sm:$0xff] }
  0x2a   :  { %v145_v4 = vld [vmem:[%s4735_s1 + $0x188] sm:$0xff] }
  0x2b   :  { %3018 = vmatmul.mubr.msk.f32.gmra.mrb[18].mxu1 %vm828_vm1, %v115_v8  ;;  %v147_v8 = vld [vmem:[%s4735_s1 + $0x198] sm:$0xff] }
  0x2c   :  { %2920 = vmatmul.mubr.msk.f32.gmra.mrb[18].mxu0 %vm169_vm0, %v51_v54  ;;  %3020 = vmatprep.mubr.msk.f32.mxu1 %vm828_vm1, %v116_v10  ;;  %v138_v54 = vld [vmem:[%s4735_s1 + $0x150] sm:$0xff]  ;;  %v148_v10 = vld [vmem:[%s4735_s1 + $0x1a0] sm:$0xff] }
  0x2d   :  { %2922 = vmatprep.mubr.msk.f32.mxu0 %vm169_vm0, %v52_v57  ;;  %v81_v57 = vld [vmem:[%s4733_s0 + $0x188] sm:$0xff] }
  0x2f   :  { %3021 = vmatmul.mubr.msk.f32.gmra.mrb[20].mxu1 %vm828_vm1, %v117_v12  ;;  %v149_v12 = vld [vmem:[%s4735_s1 + $0x1a8] sm:$0xff] }
  0x30   :  { %2923 = vmatmul.mubr.msk.f32.gmra.mrb[20].mxu0 %vm169_vm0, %v53_v61  ;;  %3023 = vmatprep.mubr.msk.f32.mxu1 %vm828_vm1, %v118_v14  ;;  %v83_v61 = vld [vmem:[%s4733_s0 + $0x198] sm:$0xff]  ;;  %v150_v14 = vld [vmem:[%s4735_s1 + $0x1b0] sm:$0xff] }
  0x31   :  { %2925 = vmatprep.mubr.msk.f32.mxu0 %vm169_vm0, %v54_v0  ;;  %v143_v0 = vld [vmem:[%s4735_s1 + $0x178] sm:$0xff] }
  0x33   :  { %3024 = vmatmul.mubr.msk.f32.gmra.mrb[22].mxu1 %vm828_vm1, %v119_v16  ;;  %v151_v16 = vld [vmem:[%s4735_s1 + $0x1b8] sm:$0xff] }
  0x34   :  { %2926 = vmatmul.mubr.msk.f32.gmra.mrb[22].mxu0 %vm169_vm0, %v55_v5  ;;  %3026 = vmatprep.mubr.msk.f32.mxu1 %vm828_vm1, %v120_v18  ;;  %v87_v5 = vld [vmem:[%s4733_s0 + $0x1b8] sm:$0xff]  ;;  %v152_v18 = vld [vmem:[%s4735_s1 + $0x1c0] sm:$0xff] }
  0x35   :  { %2928 = vmatprep.mubr.msk.f32.mxu0 %vm169_vm0, %v56_v7  ;;  %v88_v7 = vld [vmem:[%s4733_s0 + $0x1c0] sm:$0xff] }
  0x37   :  { %3027 = vmatmul.mubr.msk.f32.gmra.mrb[24].mxu1 %vm828_vm1, %v121_v20  ;;  %v153_v20 = vld [vmem:[%s4735_s1 + $0x1c8] sm:$0xff] }
  0x38   :  { %2929 = vmatmul.mubr.msk.f32.gmra.mrb[24].mxu0 %vm169_vm0, %v57_v9  ;;  %3029 = vmatprep.mubr.msk.f32.mxu1 %vm828_vm1, %v122_v22  ;;  %v89_v9 = vld [vmem:[%s4733_s0 + $0x1c8] sm:$0xff]  ;;  %v154_v22 = vld [vmem:[%s4735_s1 + $0x1d0] sm:$0xff] }
  0x39   :  { %2931 = vmatprep.mubr.msk.f32.mxu0 %vm169_vm0, %v58_v11  ;;  %v90_v11 = vld [vmem:[%s4733_s0 + $0x1d0] sm:$0xff] }
  0x3b   :  { %3030 = vmatmul.mubr.msk.f32.gmra.mrb[26].mxu1 %vm828_vm1, %v123_v24  ;;  %v156_v24 = vld [vmem:[%s4735_s1 + $0x1e0] sm:$0xff] }
  0x3c   :  { %2932 = vmatmul.mubr.msk.f32.gmra.mrb[26].mxu0 %vm169_vm0, %v59_v13  ;;  %3032 = vmatprep.mubr.msk.f32.mxu1 %vm828_vm1, %v124_v26  ;;  %v91_v13 = vld [vmem:[%s4733_s0 + $0x1d8] sm:$0xff]  ;;  %v158_v26 = vld [vmem:[%s4735_s1 + $0x1f0] sm:$0xff] }
  0x3d   :  { %2934 = vmatprep.mubr.msk.f32.mxu0 %vm169_vm0, %v60_v15  ;;  %v92_v15 = vld [vmem:[%s4733_s0 + $0x1e0] sm:$0xff] }
  0x3f   :  { %3033 = vmatmul.mubr.msk.f32.gmra.mrb[28].mxu1 %vm828_vm1, %v125_v28  ;;  %v1926_v28 = vld [vmem:[%s4737_s7] sm:$0xff] }
  0x40   :  { %2935 = vmatmul.mubr.msk.f32.gmra.mrb[28].mxu0 %vm169_vm0, %v61_v17  ;;  %3035 = vmatprep.mubr.msk.f32.mxu1 %vm828_vm1, %v126_v30  ;;  %v93_v17 = vld [vmem:[%s4733_s0 + $0x1e8] sm:$0xff] }
  0x41   :  { %2937 = vmatprep.mubr.msk.f32.mxu0 %vm169_vm0, %v62_v19  ;;  %v94_v19 = vld [vmem:[%s4733_s0 + $0x1f0] sm:$0xff] }
  0x43   :  { %3036 = vmatmul.mubr.msk.f32.gmra.mrb[30].mxu1 %vm828_vm1, %v127_v32  ;;  %v1929_v32 = vld [vmem:[%s4737_s7 + $0x18] sm:$0xff] }
  0x44   :  { %2938 = vmatmul.mubr.msk.f32.gmra.mrb[30].mxu0 %vm169_vm0, %v63_v21  ;;  %3038 = vmatprep.mubr.msk.f32.mxu1 %vm828_vm1, %v128_v34  ;;  %v95_v21 = vld [vmem:[%s4733_s0 + $0x1f8] sm:$0xff]  ;;  %v4236_v34 = vld [vmem:[%s4738_s3] ss:$0 sm:$0xff] }
  0x45   :  { %2940 = vmatprep.mubr.msk.f32.mxu0 %vm169_vm0, %v64_v23  ;;  %v155_v23 = vld [vmem:[%s4735_s1 + $0x1d8] sm:$0xff] }
  0x47   :  { %3039 = vmatmul.mubr.msk.f32.gmra.mrb[32].mxu1 %vm828_vm1, %v129_v36  ;;  %v1930_v36 = vld [vmem:[%s4737_s7 + $0x20] sm:$0xff] }
  0x48   :  { %2941 = vmatmul.mubr.msk.f32.gmra.mrb[32].mxu0 %vm169_vm0, %v65_v25  ;;  %3041 = vmatprep.mubr.msk.f32.mxu1 %vm828_vm1, %v130_v38  ;;  %v157_v25 = vld [vmem:[%s4735_s1 + $0x1e8] sm:$0xff] }
  0x49   :  { %2943 = vmatprep.mubr.msk.f32.mxu0 %vm169_vm0, %v66_v27  ;;  %v159_v27 = vld [vmem:[%s4735_s1 + $0x1f8] sm:$0xff] }
  0x4b   :  { %3042 = vmatmul.mubr.msk.f32.gmra.mrb[34].mxu1 %vm828_vm1, %v131_v40 }
  0x4c   :  { %2944 = vmatmul.mubr.msk.f32.gmra.mrb[34].mxu0 %vm169_vm0, %v67_v29  ;;  %3044 = vmatprep.mubr.msk.f32.mxu1 %vm828_vm1, %v132_v42  ;;  %v1927_v29 = vld [vmem:[%s4737_s7 + $0x8] sm:$0xff]  ;;  %v1932_v42 = vld [vmem:[%s4737_s7 + $0x30] sm:$0xff] }
  0x4d   :  { %2946 = vmatprep.mubr.msk.f32.mxu0 %vm169_vm0, %v68_v31  ;;  %v3378_v30 = vpack.c.bf16 %v1927_v29, %v1926_v28  ;;  %v1928_v31 = vld [vmem:[%s4737_s7 + $0x10] sm:$0xff] }
  0x4f   :  { %3045 = vmatmul.mubr.msk.f32.gmra.mrb[36].mxu1 %vm828_vm1, %v133_v44  ;;  %3379 = vmatprep.subr.bf16.mxu0 %v3378_v30  ;;  %v1934_v44 = vld [vmem:[%s4737_s7 + $0x40] sm:$0xff] }
  0x50   :  { %2947 = vmatmul.mubr.msk.f32.gmra.mrb[36].mxu0 %vm169_vm0, %v69_v33  ;;  %3047 = vmatprep.mubr.msk.f32.mxu1 %vm828_vm1, %v134_v46  ;;  %v3382_v33 = vpack.c.bf16 %v1929_v32, %v1928_v31 }
  0x51   :  { %2949 = vmatprep.mubr.msk.f32.mxu0 %vm169_vm0, %v70_v35  ;;  %3381 = vmatpush3.bf16.msra.mxu0 %v3378_v30 }
  0x52   :  { %3383 = vmatprep.subr.bf16.mxu0 %v3382_v33 }
  0x53   :  { %3048 = vmatmul.mubr.msk.f32.gmra.mrb[38].mxu1 %vm828_vm1, %v135_v48  ;;  %v1935_v48 = vld [vmem:[%s4737_s7 + $0x48] sm:$0xff] }
  0x54   :  { %2950 = vmatmul.mubr.msk.f32.gmra.mrb[38].mxu0 %vm169_vm0, %v71_v37  ;;  %3050 = vmatprep.mubr.msk.f32.mxu1 %vm828_vm1, %v136_v50  ;;  %v1931_v37 = vld [vmem:[%s4737_s7 + $0x28] sm:$0xff] }
  0x55   :  { %2952 = vmatprep.mubr.msk.f32.mxu0 %vm169_vm0, %v72_v39  ;;  %3385 = vmatpush3.bf16.msra.mxu0 %v3382_v33  ;;  %v3386_v40 = vpack.c.bf16 %v1931_v37, %v1930_v36 }
  0x57   :  { %3051 = vmatmul.mubr.msk.f32.gmra.mrb[40].mxu1 %vm828_vm1, %v137_v52  ;;  %3387 = vmatprep.subr.bf16.mxu0 %v3386_v40  ;;  %v3394_v52 = vpack.c.bf16 %v1935_v48, %v1934_v44 }
  0x58   :  { %2953 = vmatmul.mubr.msk.f32.gmra.mrb[40].mxu0 %vm169_vm0, %v73_v41  ;;  %3053 = vmatprep.mubr.msk.f32.mxu1 %vm828_vm1, %v138_v54  ;;  %v1936_v54 = vld [vmem:[%s4737_s7 + $0x50] sm:$0xff] }
  0x59   :  { %2955 = vmatprep.mubr.msk.f32.mxu0 %vm169_vm0, %v74_v43  ;;  %v1933_v43 = vld [vmem:[%s4737_s7 + $0x38] sm:$0xff]  ;;  %3389 = vmatpush3.bf16.msra.mxu0 %v3386_v40 }
  0x5b   :  { %3054 = vmatmul.mubr.msk.f32.gmra.mrb[42].mxu1 %vm828_vm1, %v139_v56 }
  0x5c   :  { %2956 = vmatmul.mubr.msk.f32.gmra.mrb[42].mxu0 %vm169_vm0, %v75_v45  ;;  %3056 = vmatprep.mubr.msk.f32.mxu1 %vm828_vm1, %v140_v58 }
  0x5d   :  { %2958 = vmatprep.mubr.msk.f32.mxu0 %vm169_vm0, %v76_v47  ;;  %v3390_v47 = vpack.c.bf16 %v1933_v43, %v1932_v42 }
  0x5f   :  { %3057 = vmatmul.mubr.msk.f32.gmra.mrb[44].mxu1 %vm828_vm1, %v141_v60  ;;  %3391 = vmatprep.subr.bf16.mxu0 %v3390_v47 }
  0x60   :  { %2959 = vmatmul.mubr.msk.f32.gmra.mrb[44].mxu0 %vm169_vm0, %v77_v49  ;;  %3059 = vmatprep.mubr.msk.f32.mxu1 %vm828_vm1, %v142_v62 }
  0x61   :  { %2961 = vmatprep.mubr.msk.f32.mxu0 %vm169_vm0, %v78_v51  ;;  %3393 = vmatpush3.bf16.msra.mxu0 %v3390_v47 }
  0x62   :  { %3395 = vmatprep.subr.bf16.mxu0 %v3394_v52 }
  0x63   :  { %3060 = vmatmul.mubr.msk.f32.gmra.mrb[46].mxu1 %vm828_vm1, %v143_v0  ;;  %v1939_v0 = vld [vmem:[%s4737_s7 + $0x68] sm:$0xff] }
  0x64   :  { %2962 = vmatmul.mubr.msk.f32.gmra.mrb[46].mxu0 %vm169_vm0, %v79_v53  ;;  %3062 = vmatprep.mubr.msk.f32.mxu1 %vm828_vm1, %v144_v2 }
  0x65   :  { %2964 = vmatprep.mubr.msk.f32.mxu0 %vm169_vm0, %v80_v55  ;;  %v1937_v55 = vld [vmem:[%s4737_s7 + $0x58] sm:$0xff]  ;;  %3397 = vmatpush3.bf16.msra.mxu0 %v3394_v52 }
  0x67   :  { %3063 = vmatmul.mubr.msk.f32.gmra.mrb[48].mxu1 %vm828_vm1, %v145_v4 }
  0x68   :  { %2965 = vmatmul.mubr.msk.f32.gmra.mrb[48].mxu0 %vm169_vm0, %v81_v57  ;;  %3065 = vmatprep.mubr.msk.f32.mxu1 %vm828_vm1, %v146_v6 }
  0x69   :  { %2967 = vmatprep.mubr.msk.f32.mxu0 %vm169_vm0, %v82_v59 }
  0x6b   :  { %3066 = vmatmul.mubr.msk.f32.gmra.mrb[50].mxu1 %vm828_vm1, %v147_v8  ;;  %v1940_v8 = vld [vmem:[%s4737_s7 + $0x70] sm:$0xff] }
  0x6c   :  { %2968 = vmatmul.mubr.msk.f32.gmra.mrb[50].mxu0 %vm169_vm0, %v83_v61  ;;  %3068 = vmatprep.mubr.msk.f32.mxu1 %vm828_vm1, %v148_v10  ;;  %v3398_v61 = vpack.c.bf16 %v1937_v55, %v1936_v54 }
  0x6d   :  { %2970 = vmatprep.mubr.msk.f32.mxu0 %vm169_vm0, %v84_v63  ;;  %v1938_v63 = vld [vmem:[%s4737_s7 + $0x60] sm:$0xff] }
  0x6e   :  { %3399 = vmatprep.subr.bf16.mxu0 %v3398_v61  ;;  %v3402_v6 = vpack.c.bf16 %v1939_v0, %v1938_v63 }
  0x6f   :  { %3069 = vmatmul.mubr.msk.f32.gmra.mrb[52].mxu1 %vm828_vm1, %v149_v12  ;;  %3401 = vmatpush3.bf16.msra.mxu0 %v3398_v61 }
  0x70   :  { %2971 = vmatmul.mubr.msk.f32.gmra.mrb[52].mxu0 %vm169_vm0, %v85_v1  ;;  %3071 = vmatprep.mubr.msk.f32.mxu1 %vm828_vm1, %v150_v14 }
  0x71   :  { %2973 = vmatprep.mubr.msk.f32.mxu0 %vm169_vm0, %v86_v3  ;;  %3403 = vmatprep.subr.bf16.mxu0 %v3402_v6 }
  0x73   :  { %3072 = vmatmul.mubr.msk.f32.gmra.mrb[54].mxu1 %vm828_vm1, %v151_v16  ;;  %3405 = vmatpush3.bf16.msra.mxu0 %v3402_v6 }
  0x74   :  { %2974 = vmatmul.mubr.msk.f32.gmra.mrb[54].mxu0 %vm169_vm0, %v87_v5  ;;  %3074 = vmatprep.mubr.msk.f32.mxu1 %vm828_vm1, %v152_v18 }
  0x75   :  { %2976 = vmatprep.mubr.msk.f32.mxu0 %vm169_vm0, %v88_v7 }
  0x77   :  { %3075 = vmatmul.mubr.msk.f32.gmra.mrb[56].mxu1 %vm828_vm1, %v153_v20 }
  0x78   :  { %2977 = vmatmul.mubr.msk.f32.gmra.mrb[56].mxu0 %vm169_vm0, %v89_v9  ;;  %3077 = vmatprep.mubr.msk.f32.mxu1 %vm828_vm1, %v154_v22  ;;  %v1941_v9 = vld [vmem:[%s4737_s7 + $0x78] sm:$0xff] }
  0x79   :  { %2979 = vmatprep.mubr.msk.f32.mxu0 %vm169_vm0, %v90_v11 }
  0x7b   :  { %3078 = vmatmul.mubr.msk.f32.gmra.mrb[58].mxu1 %vm828_vm1, %v155_v23 }
  0x7c   :  { %2980 = vmatmul.mubr.msk.f32.gmra.mrb[58].mxu0 %vm169_vm0, %v91_v13  ;;  %3080 = vmatprep.mubr.msk.f32.mxu1 %vm828_vm1, %v156_v24 }
  0x7d   :  { %2982 = vmatprep.mubr.msk.f32.mxu0 %vm169_vm0, %v92_v15  ;;  %v3406_v15 = vpack.c.bf16 %v1941_v9, %v1940_v8 }
  0x7f   :  { %3081 = vmatmul.mubr.msk.f32.gmra.mrb[60].mxu1 %vm828_vm1, %v157_v25  ;;  %3407 = vmatprep.subr.bf16.mxu0 %v3406_v15 }
  0x80   :  { %2983 = vmatmul.mubr.msk.f32.gmra.mrb[60].mxu0 %vm169_vm0, %v93_v17  ;;  %3083 = vmatprep.mubr.msk.f32.mxu1 %vm828_vm1, %v158_v26 }
  0x81   :  { %2985 = vmatprep.mubr.msk.f32.mxu0 %vm169_vm0, %v94_v19  ;;  %3409 = vmatpush3.bf16.msra.mxu0 %v3406_v15 }
  0x83   :  { %3084 = vmatmul.mubr.msk.f32.gmra.mrb[62].mxu1 %vm828_vm1, %v159_v27 }
  0x84   :  { %2986 = vmatmul.mubr.msk.f32.gmra.mrb[62].mxu0 %vm169_vm0, %v95_v21 }
  0xdb   :  { %v2894_v35 = vpop.f32.mrb[0].mxu0 }
  0xdc   :  { %v434_v38 = vadd.f32 %v2894_v35, %v4236_v34  ;;  %v428_v39 = vpop.f32.mrb[1].mxu0 }
  0xdd   :  { %v429_v41 = vadd.f32 %v4236_v34, %v428_v39 }
  0xde   :  { %v748_v49 = vmax.f32 %v434_v38, 0.0 }
  0xdf   :  { %v747_v45 = vmax.f32 %v429_v41, 0.0  ;;  %v2897_v46 = vpop.f32.mrb[2].mxu0 }
  0xe0   :  { %v444_v50 = vadd.f32 %v2897_v46, %v4236_v34  ;;  %v438_v51 = vpop.f32.mrb[3].mxu0 }
  0xe1   :  { %v439_v53 = vadd.f32 %v4236_v34, %v438_v51  ;;  %3118 = vmatprep.mubr.f32.mxu1 %v747_v45 }
  0xe2   :  { %3119 = vmatmul.mubr.f32.vlgmr.msra.gmra.mrb[0].mxu1 %v748_v49  ;;  %v750_v58 = vmax.f32 %v444_v50, 0.0 }
  0xe3   :  { %v749_v56 = vmax.f32 %v439_v53, 0.0  ;;  %v2900_v57 = vpop.f32.mrb[4].mxu0 }
  0xe4   :  { %v454_v59 = vadd.f32 %v2900_v57, %v4236_v34  ;;  %v448_v60 = vpop.f32.mrb[5].mxu0 }
  0xe5   :  { %v449_v62 = vadd.f32 %v4236_v34, %v448_v60  ;;  %3121 = vmatprep.mubr.f32.mxu1 %v749_v56 }
  0xe6   :  { %3122 = vmatmul.mubr.f32.gmra.mrb[2].mxu1 %v750_v58  ;;  %v752_v3 = vmax.f32 %v454_v59, 0.0 }
  0xe7   :  { %v751_v1 = vmax.f32 %v449_v62, 0.0  ;;  %v2903_v2 = vpop.f32.mrb[6].mxu0 }
  0xe8   :  { %v464_v4 = vadd.f32 %v2903_v2, %v4236_v34  ;;  %v458_v5 = vpop.f32.mrb[7].mxu0 }
  0xe9   :  { %v459_v7 = vadd.f32 %v4236_v34, %v458_v5  ;;  %3124 = vmatprep.mubr.f32.mxu1 %v751_v1 }
  0xea   :  { %3125 = vmatmul.mubr.f32.gmra.mrb[4].mxu1 %v752_v3  ;;  %v754_v12 = vmax.f32 %v464_v4, 0.0 }
  0xeb   :  { %v753_v10 = vmax.f32 %v459_v7, 0.0  ;;  %v2906_v11 = vpop.f32.mrb[8].mxu0 }
  0xec   :  { %v474_v13 = vadd.f32 %v2906_v11, %v4236_v34  ;;  %v468_v14 = vpop.f32.mrb[9].mxu0 }
  0xed   :  { %v469_v16 = vadd.f32 %v4236_v34, %v468_v14  ;;  %3127 = vmatprep.mubr.f32.mxu1 %v753_v10 }
  0xee   :  { %3128 = vmatmul.mubr.f32.gmra.mrb[6].mxu1 %v754_v12  ;;  %v756_v19 = vmax.f32 %v474_v13, 0.0 }
  0xef   :  { %v755_v17 = vmax.f32 %v469_v16, 0.0  ;;  %v2909_v18 = vpop.f32.mrb[10].mxu0 }
  0xf0   :  { %v484_v20 = vadd.f32 %v2909_v18, %v4236_v34  ;;  %v478_v21 = vpop.f32.mrb[11].mxu0 }
  0xf1   :  { %v479_v22 = vadd.f32 %v4236_v34, %v478_v21  ;;  %3130 = vmatprep.mubr.f32.mxu1 %v755_v17 }
  0xf2   :  { %3131 = vmatmul.mubr.f32.gmra.mrb[8].mxu1 %v756_v19  ;;  %v758_v25 = vmax.f32 %v484_v20, 0.0 }
  0xf3   :  { %v757_v23 = vmax.f32 %v479_v22, 0.0  ;;  %v2912_v24 = vpop.f32.mrb[12].mxu0 }
  0xf4   :  { %v494_v26 = vadd.f32 %v2912_v24, %v4236_v34  ;;  %v488_v27 = vpop.f32.mrb[13].mxu0 }
  0xf5   :  { %v489_v28 = vadd.f32 %v4236_v34, %v488_v27  ;;  %3133 = vmatprep.mubr.f32.mxu1 %v757_v23 }
  0xf6   :  { %3134 = vmatmul.mubr.f32.gmra.mrb[10].mxu1 %v758_v25  ;;  %v760_v31 = vmax.f32 %v494_v26, 0.0 }
  0xf7   :  { %v759_v29 = vmax.f32 %v489_v28, 0.0  ;;  %v2915_v30 = vpop.f32.mrb[14].mxu0 }
  0xf8   :  { %v504_v32 = vadd.f32 %v2915_v30, %v4236_v34  ;;  %v498_v33 = vpop.f32.mrb[15].mxu0 }
  0xf9   :  { %v499_v35 = vadd.f32 %v4236_v34, %v498_v33  ;;  %3136 = vmatprep.mubr.f32.mxu1 %v759_v29 }
  0xfa   :  { %3137 = vmatmul.mubr.f32.gmra.mrb[12].mxu1 %v760_v31  ;;  %v762_v38 = vmax.f32 %v504_v32, 0.0 }
  0xfb   :  { %v761_v36 = vmax.f32 %v499_v35, 0.0  ;;  %v2918_v37 = vpop.f32.mrb[16].mxu0 }
  0xfc   :  { %v514_v39 = vadd.f32 %v2918_v37, %v4236_v34  ;;  %v508_v40 = vpop.f32.mrb[17].mxu0 }
  0xfd   :  { %v509_v41 = vadd.f32 %v4236_v34, %v508_v40  ;;  %3139 = vmatprep.mubr.f32.mxu1 %v761_v36 }
  0xfe   :  { %3140 = vmatmul.mubr.f32.gmra.mrb[14].mxu1 %v762_v38  ;;  %v764_v44 = vmax.f32 %v514_v39, 0.0 }
  0xff   :  { %v763_v42 = vmax.f32 %v509_v41, 0.0  ;;  %v2921_v43 = vpop.f32.mrb[18].mxu0 }
 0x100   :  { %v524_v45 = vadd.f32 %v2921_v43, %v4236_v34  ;;  %v518_v46 = vpop.f32.mrb[19].mxu0 }
 0x101   :  { %v519_v47 = vadd.f32 %v4236_v34, %v518_v46  ;;  %3142 = vmatprep.mubr.f32.mxu1 %v763_v42 }
 0x102   :  { %3143 = vmatmul.mubr.f32.gmra.mrb[16].mxu1 %v764_v44  ;;  %v766_v50 = vmax.f32 %v524_v45, 0.0 }
 0x103   :  { %v765_v48 = vmax.f32 %v519_v47, 0.0  ;;  %v2924_v49 = vpop.f32.mrb[20].mxu0 }
 0x104   :  { %v534_v51 = vadd.f32 %v2924_v49, %v4236_v34  ;;  %v528_v52 = vpop.f32.mrb[21].mxu0 }
 0x105   :  { %v529_v53 = vadd.f32 %v4236_v34, %v528_v52  ;;  %3145 = vmatprep.mubr.f32.mxu1 %v765_v48 }
 0x106   :  { %3146 = vmatmul.mubr.f32.gmra.mrb[18].mxu1 %v766_v50  ;;  %v768_v56 = vmax.f32 %v534_v51, 0.0 }
 0x107   :  { %v767_v54 = vmax.f32 %v529_v53, 0.0  ;;  %v2927_v55 = vpop.f32.mrb[22].mxu0 }
 0x108   :  { %v544_v57 = vadd.f32 %v2927_v55, %v4236_v34  ;;  %v538_v58 = vpop.f32.mrb[23].mxu0 }
 0x109   :  { %v539_v59 = vadd.f32 %v4236_v34, %v538_v58  ;;  %3148 = vmatprep.mubr.f32.mxu1 %v767_v54 }
 0x10a   :  { %3149 = vmatmul.mubr.f32.gmra.mrb[20].mxu1 %v768_v56  ;;  %v770_v62 = vmax.f32 %v544_v57, 0.0 }
 0x10b   :  { %v769_v60 = vmax.f32 %v539_v59, 0.0  ;;  %v2930_v61 = vpop.f32.mrb[24].mxu0 }
 0x10c   :  { %v554_v63 = vadd.f32 %v2930_v61, %v4236_v34  ;;  %v548_v0 = vpop.f32.mrb[25].mxu0 }
 0x10d   :  { %v549_v1 = vadd.f32 %v4236_v34, %v548_v0  ;;  %3151 = vmatprep.mubr.f32.mxu1 %v769_v60 }
 0x10e   :  { %3152 = vmatmul.mubr.f32.gmra.mrb[22].mxu1 %v770_v62  ;;  %v772_v4 = vmax.f32 %v554_v63, 0.0 }
 0x10f   :  { %v771_v2 = vmax.f32 %v549_v1, 0.0  ;;  %v2933_v3 = vpop.f32.mrb[26].mxu0 }
 0x110   :  { %v564_v5 = vadd.f32 %v2933_v3, %v4236_v34  ;;  %v558_v6 = vpop.f32.mrb[27].mxu0 }
 0x111   :  { %v559_v7 = vadd.f32 %v4236_v34, %v558_v6  ;;  %3154 = vmatprep.mubr.f32.mxu1 %v771_v2 }
 0x112   :  { %3155 = vmatmul.mubr.f32.gmra.mrb[24].mxu1 %v772_v4  ;;  %v774_v10 = vmax.f32 %v564_v5, 0.0 }
 0x113   :  { %v773_v8 = vmax.f32 %v559_v7, 0.0  ;;  %v2936_v9 = vpop.f32.mrb[28].mxu0 }
 0x114   :  { %v574_v11 = vadd.f32 %v2936_v9, %v4236_v34  ;;  %v568_v12 = vpop.f32.mrb[29].mxu0 }
 0x115   :  { %v569_v13 = vadd.f32 %v4236_v34, %v568_v12  ;;  %3157 = vmatprep.mubr.f32.mxu1 %v773_v8 }
 0x116   :  { %3158 = vmatmul.mubr.f32.gmra.mrb[26].mxu1 %v774_v10  ;;  %v776_v16 = vmax.f32 %v574_v11, 0.0 }
 0x117   :  { %v775_v14 = vmax.f32 %v569_v13, 0.0  ;;  %v2939_v15 = vpop.f32.mrb[30].mxu0 }
 0x118   :  { %v584_v17 = vadd.f32 %v2939_v15, %v4236_v34  ;;  %v578_v18 = vpop.f32.mrb[31].mxu0 }
 0x119   :  { %v579_v19 = vadd.f32 %v4236_v34, %v578_v18  ;;  %3160 = vmatprep.mubr.f32.mxu1 %v775_v14 }
 0x11a   :  { %3161 = vmatmul.mubr.f32.gmra.mrb[28].mxu1 %v776_v16  ;;  %v778_v22 = vmax.f32 %v584_v17, 0.0 }
 0x11b   :  { %v777_v20 = vmax.f32 %v579_v19, 0.0  ;;  %v2942_v21 = vpop.f32.mrb[32].mxu0 }
 0x11c   :  { %v594_v23 = vadd.f32 %v2942_v21, %v4236_v34  ;;  %v588_v24 = vpop.f32.mrb[33].mxu0 }
 0x11d   :  { %v589_v25 = vadd.f32 %v4236_v34, %v588_v24  ;;  %3163 = vmatprep.mubr.f32.mxu1 %v777_v20 }
 0x11e   :  { %3164 = vmatmul.mubr.f32.gmra.mrb[30].mxu1 %v778_v22  ;;  %v780_v28 = vmax.f32 %v594_v23, 0.0 }
 0x11f   :  { %v779_v26 = vmax.f32 %v589_v25, 0.0  ;;  %v2945_v27 = vpop.f32.mrb[34].mxu0 }
 0x120   :  { %v604_v29 = vadd.f32 %v2945_v27, %v4236_v34  ;;  %v598_v30 = vpop.f32.mrb[35].mxu0 }
 0x121   :  { %v599_v31 = vadd.f32 %v4236_v34, %v598_v30  ;;  %3166 = vmatprep.mubr.f32.mxu1 %v779_v26 }
 0x122   :  { %3167 = vmatmul.mubr.f32.gmra.mrb[32].mxu1 %v780_v28  ;;  %v782_v35 = vmax.f32 %v604_v29, 0.0 }
 0x123   :  { %v781_v32 = vmax.f32 %v599_v31, 0.0  ;;  %v2948_v33 = vpop.f32.mrb[36].mxu0 }
 0x124   :  { %v614_v36 = vadd.f32 %v2948_v33, %v4236_v34  ;;  %v608_v37 = vpop.f32.mrb[37].mxu0 }
 0x125   :  { %v609_v38 = vadd.f32 %v4236_v34, %v608_v37  ;;  %3169 = vmatprep.mubr.f32.mxu1 %v781_v32 }
 0x126   :  { %3170 = vmatmul.mubr.f32.gmra.mrb[34].mxu1 %v782_v35  ;;  %v784_v41 = vmax.f32 %v614_v36, 0.0 }
 0x127   :  { %v783_v39 = vmax.f32 %v609_v38, 0.0  ;;  %v2951_v40 = vpop.f32.mrb[38].mxu0 }
 0x128   :  { %v624_v42 = vadd.f32 %v2951_v40, %v4236_v34  ;;  %v618_v43 = vpop.f32.mrb[39].mxu0 }
 0x129   :  { %v619_v44 = vadd.f32 %v4236_v34, %v618_v43  ;;  %3172 = vmatprep.mubr.f32.mxu1 %v783_v39 }
 0x12a   :  { %3173 = vmatmul.mubr.f32.gmra.mrb[36].mxu1 %v784_v41  ;;  %v786_v47 = vmax.f32 %v624_v42, 0.0 }
 0x12b   :  { %v785_v45 = vmax.f32 %v619_v44, 0.0  ;;  %v2954_v46 = vpop.f32.mrb[40].mxu0 }
 0x12c   :  { %v634_v48 = vadd.f32 %v2954_v46, %v4236_v34  ;;  %v628_v49 = vpop.f32.mrb[41].mxu0 }
 0x12d   :  { %v629_v50 = vadd.f32 %v4236_v34, %v628_v49  ;;  %3175 = vmatprep.mubr.f32.mxu1 %v785_v45 }
 0x12e   :  { %3176 = vmatmul.mubr.f32.gmra.mrb[38].mxu1 %v786_v47  ;;  %v788_v53 = vmax.f32 %v634_v48, 0.0 }
 0x12f   :  { %v787_v51 = vmax.f32 %v629_v50, 0.0  ;;  %v2957_v52 = vpop.f32.mrb[42].mxu0 }
 0x130   :  { %v644_v54 = vadd.f32 %v2957_v52, %v4236_v34  ;;  %v638_v55 = vpop.f32.mrb[43].mxu0 }
 0x131   :  { %v639_v56 = vadd.f32 %v4236_v34, %v638_v55  ;;  %3178 = vmatprep.mubr.f32.mxu1 %v787_v51 }
 0x132   :  { %3179 = vmatmul.mubr.f32.gmra.mrb[40].mxu1 %v788_v53  ;;  %v790_v59 = vmax.f32 %v644_v54, 0.0 }
 0x133   :  { %v789_v57 = vmax.f32 %v639_v56, 0.0  ;;  %v2960_v58 = vpop.f32.mrb[44].mxu0  ;;  %v4341_v56 = vld [vmem:[%s4739_s6] ss:$0 sm:$0xff] }
 0x134   :  { %v654_v60 = vadd.f32 %v2960_v58, %v4236_v34  ;;  %v648_v61 = vpop.f32.mrb[45].mxu0 }
 0x135   :  { %v649_v62 = vadd.f32 %v4236_v34, %v648_v61  ;;  %3181 = vmatprep.mubr.f32.mxu1 %v789_v57 }
 0x136   :  { %3182 = vmatmul.mubr.f32.gmra.mrb[42].mxu1 %v790_v59  ;;  %v792_v1 = vmax.f32 %v654_v60, 0.0 }
 0x137   :  { %v791_v63 = vmax.f32 %v649_v62, 0.0  ;;  %v2963_v0 = vpop.f32.mrb[46].mxu0 }
 0x138   :  { %v664_v2 = vadd.f32 %v2963_v0, %v4236_v34  ;;  %v658_v3 = vpop.f32.mrb[47].mxu0 }
 0x139   :  { %v659_v4 = vadd.f32 %v4236_v34, %v658_v3  ;;  %3184 = vmatprep.mubr.f32.mxu1 %v791_v63 }
 0x13a   :  { %3185 = vmatmul.mubr.f32.gmra.mrb[44].mxu1 %v792_v1  ;;  %v794_v7 = vmax.f32 %v664_v2, 0.0 }
 0x13b   :  { %v793_v5 = vmax.f32 %v659_v4, 0.0  ;;  %v2966_v6 = vpop.f32.mrb[48].mxu0 }
 0x13c   :  { %v674_v8 = vadd.f32 %v2966_v6, %v4236_v34  ;;  %v668_v9 = vpop.f32.mrb[49].mxu0 }
 0x13d   :  { %v669_v10 = vadd.f32 %v4236_v34, %v668_v9  ;;  %3187 = vmatprep.mubr.f32.mxu1 %v793_v5 }
 0x13e   :  { %3188 = vmatmul.mubr.f32.gmra.mrb[46].mxu1 %v794_v7  ;;  %v796_v13 = vmax.f32 %v674_v8, 0.0 }
 0x13f   :  { %v795_v11 = vmax.f32 %v669_v10, 0.0  ;;  %v2969_v12 = vpop.f32.mrb[50].mxu0 }
 0x140   :  { %v684_v14 = vadd.f32 %v2969_v12, %v4236_v34  ;;  %v678_v15 = vpop.f32.mrb[51].mxu0 }
 0x141   :  { %v679_v16 = vadd.f32 %v4236_v34, %v678_v15  ;;  %3190 = vmatprep.mubr.f32.mxu1 %v795_v11 }
 0x142   :  { %3191 = vmatmul.mubr.f32.gmra.mrb[48].mxu1 %v796_v13  ;;  %v798_v19 = vmax.f32 %v684_v14, 0.0 }
 0x143   :  { %v797_v17 = vmax.f32 %v679_v16, 0.0  ;;  %v2972_v18 = vpop.f32.mrb[52].mxu0 }
 0x144   :  { %v694_v20 = vadd.f32 %v2972_v18, %v4236_v34  ;;  %v688_v21 = vpop.f32.mrb[53].mxu0 }
 0x145   :  { %v689_v22 = vadd.f32 %v4236_v34, %v688_v21  ;;  %3193 = vmatprep.mubr.f32.mxu1 %v797_v17 }
 0x146   :  { %3194 = vmatmul.mubr.f32.gmra.mrb[50].mxu1 %v798_v19  ;;  %v800_v25 = vmax.f32 %v694_v20, 0.0 }
 0x147   :  { %v799_v23 = vmax.f32 %v689_v22, 0.0  ;;  %v2975_v24 = vpop.f32.mrb[54].mxu0 }
 0x148   :  { %v704_v26 = vadd.f32 %v2975_v24, %v4236_v34  ;;  %v698_v27 = vpop.f32.mrb[55].mxu0 }
 0x149   :  { %v699_v28 = vadd.f32 %v4236_v34, %v698_v27  ;;  %3196 = vmatprep.mubr.f32.mxu1 %v799_v23 }
 0x14a   :  { %3197 = vmatmul.mubr.f32.gmra.mrb[52].mxu1 %v800_v25  ;;  %v802_v31 = vmax.f32 %v704_v26, 0.0 }
 0x14b   :  { %v801_v29 = vmax.f32 %v699_v28, 0.0  ;;  %v2978_v30 = vpop.f32.mrb[56].mxu0 }
 0x14c   :  { %v714_v32 = vadd.f32 %v2978_v30, %v4236_v34  ;;  %v708_v33 = vpop.f32.mrb[57].mxu0 }
 0x14d   :  { %v709_v35 = vadd.f32 %v4236_v34, %v708_v33  ;;  %3199 = vmatprep.mubr.f32.mxu1 %v801_v29 }
 0x14e   :  { %3200 = vmatmul.mubr.f32.gmra.mrb[54].mxu1 %v802_v31  ;;  %v804_v38 = vmax.f32 %v714_v32, 0.0 }
 0x14f   :  { %v803_v36 = vmax.f32 %v709_v35, 0.0  ;;  %v2981_v37 = vpop.f32.mrb[58].mxu0 }
 0x150   :  { %v724_v39 = vadd.f32 %v2981_v37, %v4236_v34  ;;  %v718_v40 = vpop.f32.mrb[59].mxu0 }
 0x151   :  { %v719_v41 = vadd.f32 %v4236_v34, %v718_v40  ;;  %3202 = vmatprep.mubr.f32.mxu1 %v803_v36 }
 0x152   :  { %3203 = vmatmul.mubr.f32.gmra.mrb[56].mxu1 %v804_v38  ;;  %v806_v44 = vmax.f32 %v724_v39, 0.0 }
 0x153   :  { %v805_v42 = vmax.f32 %v719_v41, 0.0  ;;  %v2984_v43 = vpop.f32.mrb[60].mxu0 }
 0x154   :  { %v734_v45 = vadd.f32 %v2984_v43, %v4236_v34  ;;  %v728_v46 = vpop.f32.mrb[61].mxu0 }
 0x155   :  { %v729_v47 = vadd.f32 %v4236_v34, %v728_v46  ;;  %3205 = vmatprep.mubr.f32.mxu1 %v805_v42 }
 0x156   :  { %3206 = vmatmul.mubr.f32.gmra.mrb[58].mxu1 %v806_v44  ;;  %v808_v50 = vmax.f32 %v734_v45, 0.0 }
 0x157   :  { %v807_v48 = vmax.f32 %v729_v47, 0.0  ;;  %v2987_v49 = vpop.f32.mrb[62].mxu0 }
 0x158   :  { %v744_v51 = vadd.f32 %v2987_v49, %v4236_v34  ;;  %v738_v52 = vpop.f32.mrb[63].mxu0 }
 0x159   :  { %v739_v53 = vadd.f32 %v4236_v34, %v738_v52  ;;  %3208 = vmatprep.mubr.f32.mxu1 %v807_v48 }
 0x15a   :  { %3209 = vmatmul.mubr.f32.gmra.mrb[60].mxu1 %v808_v50  ;;  %v810_v55 = vmax.f32 %v744_v51, 0.0 }
 0x15b   :  { %v809_v54 = vmax.f32 %v739_v53, 0.0 }
 0x15d   :  { %3211 = vmatprep.mubr.f32.mxu1 %v809_v54 }
 0x15e   :  { %3212 = vmatmul.mubr.f32.gmra.mrb[62].mxu1 %v810_v55 }
 0x1b5   :  { %v3120_v57 = vpop.f32.mrb[0].mxu1 }
 0x1b6   :  { %v1799_v58 = vadd.f32 %v3120_v57, %v4341_v56  ;;  %v1472_v59 = vpop.f32.mrb[1].mxu1 }
 0x1b7   :  { %v1798_v60 = vadd.f32 %v4341_v56, %v1472_v59 }
 0x1b8   :  { %v1863_v34 = vmax.f32 %v1799_v58, 0.0 }
 0x1b9   :  { %v1862_v61 = vmax.f32 %v1798_v60, 0.0  ;;  %v3123_v62 = vpop.f32.mrb[2].mxu1 }
 0x1ba   :  { %v1801_v63 = vadd.f32 %v3123_v62, %v4341_v56  ;;  %v1482_v0 = vpop.f32.mrb[3].mxu1 }
 0x1bb   :  { %v1800_v1 = vadd.f32 %v4341_v56, %v1482_v0  ;;  %3246 = vmatprep.mubr.f32.mxu0 %v1862_v61 }
 0x1bc   :  { %3247 = vmatmul.mubr.f32.vlgmr.msra.gmra.mrb[64].mxu0 %v1863_v34  ;;  %v1865_v4 = vmax.f32 %v1801_v63, 0.0 }
 0x1bd   :  { %v1864_v2 = vmax.f32 %v1800_v1, 0.0  ;;  %v3126_v3 = vpop.f32.mrb[4].mxu1 }
 0x1be   :  { %v1803_v5 = vadd.f32 %v3126_v3, %v4341_v56  ;;  %v1492_v6 = vpop.f32.mrb[5].mxu1 }
 0x1bf   :  { %v1802_v7 = vadd.f32 %v4341_v56, %v1492_v6  ;;  %3249 = vmatprep.mubr.f32.mxu0 %v1864_v2 }
 0x1c0   :  { %3250 = vmatmul.mubr.f32.gmra.mrb[66].mxu0 %v1865_v4  ;;  %v1867_v10 = vmax.f32 %v1803_v5, 0.0 }
 0x1c1   :  { %v1866_v8 = vmax.f32 %v1802_v7, 0.0  ;;  %v3129_v9 = vpop.f32.mrb[6].mxu1 }
 0x1c2   :  { %v1805_v11 = vadd.f32 %v3129_v9, %v4341_v56  ;;  %v1502_v12 = vpop.f32.mrb[7].mxu1 }
 0x1c3   :  { %v1804_v13 = vadd.f32 %v4341_v56, %v1502_v12  ;;  %3252 = vmatprep.mubr.f32.mxu0 %v1866_v8 }
 0x1c4   :  { %3253 = vmatmul.mubr.f32.gmra.mrb[68].mxu0 %v1867_v10  ;;  %v1869_v16 = vmax.f32 %v1805_v11, 0.0 }
 0x1c5   :  { %v1868_v14 = vmax.f32 %v1804_v13, 0.0  ;;  %v3132_v15 = vpop.f32.mrb[8].mxu1 }
 0x1c6   :  { %v1807_v17 = vadd.f32 %v3132_v15, %v4341_v56  ;;  %v1512_v18 = vpop.f32.mrb[9].mxu1 }
 0x1c7   :  { %v1806_v19 = vadd.f32 %v4341_v56, %v1512_v18  ;;  %3255 = vmatprep.mubr.f32.mxu0 %v1868_v14 }
 0x1c8   :  { %3256 = vmatmul.mubr.f32.gmra.mrb[70].mxu0 %v1869_v16  ;;  %v1871_v22 = vmax.f32 %v1807_v17, 0.0 }
 0x1c9   :  { %v1870_v20 = vmax.f32 %v1806_v19, 0.0  ;;  %v3135_v21 = vpop.f32.mrb[10].mxu1 }
 0x1ca   :  { %v1809_v23 = vadd.f32 %v3135_v21, %v4341_v56  ;;  %v1522_v24 = vpop.f32.mrb[11].mxu1 }
 0x1cb   :  { %v1808_v25 = vadd.f32 %v4341_v56, %v1522_v24  ;;  %3258 = vmatprep.mubr.f32.mxu0 %v1870_v20 }
 0x1cc   :  { %3259 = vmatmul.mubr.f32.gmra.mrb[72].mxu0 %v1871_v22  ;;  %v1873_v28 = vmax.f32 %v1809_v23, 0.0 }
 0x1cd   :  { %v1872_v26 = vmax.f32 %v1808_v25, 0.0  ;;  %v3138_v27 = vpop.f32.mrb[12].mxu1 }
 0x1ce   :  { %v1811_v29 = vadd.f32 %v3138_v27, %v4341_v56  ;;  %v1532_v30 = vpop.f32.mrb[13].mxu1 }
 0x1cf   :  { %v1810_v31 = vadd.f32 %v4341_v56, %v1532_v30  ;;  %3261 = vmatprep.mubr.f32.mxu0 %v1872_v26 }
 0x1d0   :  { %3262 = vmatmul.mubr.f32.gmra.mrb[74].mxu0 %v1873_v28  ;;  %v1875_v35 = vmax.f32 %v1811_v29, 0.0 }
 0x1d1   :  { %v1874_v32 = vmax.f32 %v1810_v31, 0.0  ;;  %v3141_v33 = vpop.f32.mrb[14].mxu1 }
 0x1d2   :  { %v1813_v36 = vadd.f32 %v3141_v33, %v4341_v56  ;;  %v1542_v37 = vpop.f32.mrb[15].mxu1 }
 0x1d3   :  { %v1812_v38 = vadd.f32 %v4341_v56, %v1542_v37  ;;  %3264 = vmatprep.mubr.f32.mxu0 %v1874_v32 }
 0x1d4   :  { %3265 = vmatmul.mubr.f32.gmra.mrb[76].mxu0 %v1875_v35  ;;  %v1877_v41 = vmax.f32 %v1813_v36, 0.0 }
 0x1d5   :  { %v1876_v39 = vmax.f32 %v1812_v38, 0.0  ;;  %v3144_v40 = vpop.f32.mrb[16].mxu1 }
 0x1d6   :  { %v1815_v42 = vadd.f32 %v3144_v40, %v4341_v56  ;;  %v1552_v43 = vpop.f32.mrb[17].mxu1 }
 0x1d7   :  { %v1814_v44 = vadd.f32 %v4341_v56, %v1552_v43  ;;  %3267 = vmatprep.mubr.f32.mxu0 %v1876_v39 }
 0x1d8   :  { %3268 = vmatmul.mubr.f32.gmra.mrb[78].mxu0 %v1877_v41  ;;  %v1879_v47 = vmax.f32 %v1815_v42, 0.0 }
 0x1d9   :  { %v1878_v45 = vmax.f32 %v1814_v44, 0.0  ;;  %v3147_v46 = vpop.f32.mrb[18].mxu1 }
 0x1da   :  { %v1817_v48 = vadd.f32 %v3147_v46, %v4341_v56  ;;  %v1562_v49 = vpop.f32.mrb[19].mxu1 }
 0x1db   :  { %v1816_v50 = vadd.f32 %v4341_v56, %v1562_v49  ;;  %3270 = vmatprep.mubr.f32.mxu0 %v1878_v45 }
 0x1dc   :  { %3271 = vmatmul.mubr.f32.gmra.mrb[80].mxu0 %v1879_v47  ;;  %v1881_v53 = vmax.f32 %v1817_v48, 0.0 }
 0x1dd   :  { %v1880_v51 = vmax.f32 %v1816_v50, 0.0  ;;  %v3150_v52 = vpop.f32.mrb[20].mxu1 }
 0x1de   :  { %v1819_v54 = vadd.f32 %v3150_v52, %v4341_v56  ;;  %v1572_v55 = vpop.f32.mrb[21].mxu1 }
 0x1df   :  { %v1818_v57 = vadd.f32 %v4341_v56, %v1572_v55  ;;  %3273 = vmatprep.mubr.f32.mxu0 %v1880_v51 }
 0x1e0   :  { %3274 = vmatmul.mubr.f32.gmra.mrb[82].mxu0 %v1881_v53  ;;  %v1883_v60 = vmax.f32 %v1819_v54, 0.0 }
 0x1e1   :  { %v1882_v58 = vmax.f32 %v1818_v57, 0.0  ;;  %v3153_v59 = vpop.f32.mrb[22].mxu1 }
 0x1e2   :  { %v1821_v61 = vadd.f32 %v3153_v59, %v4341_v56  ;;  %v1582_v62 = vpop.f32.mrb[23].mxu1 }
 0x1e3   :  { %v1820_v34 = vadd.f32 %v4341_v56, %v1582_v62  ;;  %3276 = vmatprep.mubr.f32.mxu0 %v1882_v58 }
 0x1e4   :  { %3277 = vmatmul.mubr.f32.gmra.mrb[84].mxu0 %v1883_v60  ;;  %v1885_v1 = vmax.f32 %v1821_v61, 0.0 }
 0x1e5   :  { %v1884_v63 = vmax.f32 %v1820_v34, 0.0  ;;  %v3156_v0 = vpop.f32.mrb[24].mxu1 }
 0x1e6   :  { %v1823_v2 = vadd.f32 %v3156_v0, %v4341_v56  ;;  %v1592_v3 = vpop.f32.mrb[25].mxu1 }
 0x1e7   :  { %v1822_v4 = vadd.f32 %v4341_v56, %v1592_v3  ;;  %3279 = vmatprep.mubr.f32.mxu0 %v1884_v63 }
 0x1e8   :  { %3280 = vmatmul.mubr.f32.gmra.mrb[86].mxu0 %v1885_v1  ;;  %v1887_v7 = vmax.f32 %v1823_v2, 0.0 }
 0x1e9   :  { %v1886_v5 = vmax.f32 %v1822_v4, 0.0  ;;  %v3159_v6 = vpop.f32.mrb[26].mxu1 }
 0x1ea   :  { %v1825_v8 = vadd.f32 %v3159_v6, %v4341_v56  ;;  %v1602_v9 = vpop.f32.mrb[27].mxu1 }
 0x1eb   :  { %v1824_v10 = vadd.f32 %v4341_v56, %v1602_v9  ;;  %3282 = vmatprep.mubr.f32.mxu0 %v1886_v5 }
 0x1ec   :  { %3283 = vmatmul.mubr.f32.gmra.mrb[88].mxu0 %v1887_v7  ;;  %v1889_v13 = vmax.f32 %v1825_v8, 0.0 }
 0x1ed   :  { %v1888_v11 = vmax.f32 %v1824_v10, 0.0  ;;  %v3162_v12 = vpop.f32.mrb[28].mxu1 }
 0x1ee   :  { %v1827_v14 = vadd.f32 %v3162_v12, %v4341_v56  ;;  %v1612_v15 = vpop.f32.mrb[29].mxu1 }
 0x1ef   :  { %v1826_v16 = vadd.f32 %v4341_v56, %v1612_v15  ;;  %3285 = vmatprep.mubr.f32.mxu0 %v1888_v11 }
 0x1f0   :  { %3286 = vmatmul.mubr.f32.gmra.mrb[90].mxu0 %v1889_v13  ;;  %v1891_v19 = vmax.f32 %v1827_v14, 0.0 }
 0x1f1   :  { %v1890_v17 = vmax.f32 %v1826_v16, 0.0  ;;  %v3165_v18 = vpop.f32.mrb[30].mxu1 }
 0x1f2   :  { %v1829_v20 = vadd.f32 %v3165_v18, %v4341_v56  ;;  %v1622_v21 = vpop.f32.mrb[31].mxu1 }
 0x1f3   :  { %v1828_v22 = vadd.f32 %v4341_v56, %v1622_v21  ;;  %3288 = vmatprep.mubr.f32.mxu0 %v1890_v17 }
 0x1f4   :  { %3289 = vmatmul.mubr.f32.gmra.mrb[92].mxu0 %v1891_v19  ;;  %v1893_v25 = vmax.f32 %v1829_v20, 0.0 }
 0x1f5   :  { %v1892_v23 = vmax.f32 %v1828_v22, 0.0  ;;  %v3168_v24 = vpop.f32.mrb[32].mxu1 }
 0x1f6   :  { %v1831_v26 = vadd.f32 %v3168_v24, %v4341_v56  ;;  %v1632_v27 = vpop.f32.mrb[33].mxu1 }
 0x1f7   :  { %v1830_v28 = vadd.f32 %v4341_v56, %v1632_v27  ;;  %3291 = vmatprep.mubr.f32.mxu0 %v1892_v23 }
 0x1f8   :  { %3292 = vmatmul.mubr.f32.gmra.mrb[94].mxu0 %v1893_v25  ;;  %v1895_v31 = vmax.f32 %v1831_v26, 0.0 }
 0x1f9   :  { %v1894_v29 = vmax.f32 %v1830_v28, 0.0  ;;  %v3171_v30 = vpop.f32.mrb[34].mxu1 }
 0x1fa   :  { %v1833_v32 = vadd.f32 %v3171_v30, %v4341_v56  ;;  %v1642_v33 = vpop.f32.mrb[35].mxu1 }
 0x1fb   :  { %v1832_v35 = vadd.f32 %v4341_v56, %v1642_v33  ;;  %3294 = vmatprep.mubr.f32.mxu0 %v1894_v29 }
 0x1fc   :  { %3295 = vmatmul.mubr.f32.gmra.mrb[96].mxu0 %v1895_v31  ;;  %v1897_v38 = vmax.f32 %v1833_v32, 0.0 }
 0x1fd   :  { %v1896_v36 = vmax.f32 %v1832_v35, 0.0  ;;  %v3174_v37 = vpop.f32.mrb[36].mxu1 }
 0x1fe   :  { %v1835_v39 = vadd.f32 %v3174_v37, %v4341_v56  ;;  %v1652_v40 = vpop.f32.mrb[37].mxu1 }
 0x1ff   :  { %v1834_v41 = vadd.f32 %v4341_v56, %v1652_v40  ;;  %3297 = vmatprep.mubr.f32.mxu0 %v1896_v36 }
 0x200   :  { %3298 = vmatmul.mubr.f32.gmra.mrb[98].mxu0 %v1897_v38  ;;  %v1899_v44 = vmax.f32 %v1835_v39, 0.0 }
 0x201   :  { %v1898_v42 = vmax.f32 %v1834_v41, 0.0  ;;  %v3177_v43 = vpop.f32.mrb[38].mxu1 }
 0x202   :  { %v1837_v45 = vadd.f32 %v3177_v43, %v4341_v56  ;;  %v1662_v46 = vpop.f32.mrb[39].mxu1 }
 0x203   :  { %v1836_v47 = vadd.f32 %v4341_v56, %v1662_v46  ;;  %3300 = vmatprep.mubr.f32.mxu0 %v1898_v42 }
 0x204   :  { %3301 = vmatmul.mubr.f32.gmra.mrb[100].mxu0 %v1899_v44  ;;  %v1901_v50 = vmax.f32 %v1837_v45, 0.0 }
 0x205   :  { %v1900_v48 = vmax.f32 %v1836_v47, 0.0  ;;  %v3180_v49 = vpop.f32.mrb[40].mxu1 }
 0x206   :  { %v1839_v51 = vadd.f32 %v3180_v49, %v4341_v56  ;;  %v1672_v52 = vpop.f32.mrb[41].mxu1 }
 0x207   :  { %v1838_v53 = vadd.f32 %v4341_v56, %v1672_v52  ;;  %3303 = vmatprep.mubr.f32.mxu0 %v1900_v48 }
 0x208   :  { %3304 = vmatmul.mubr.f32.gmra.mrb[102].mxu0 %v1901_v50  ;;  %v1903_v57 = vmax.f32 %v1839_v51, 0.0 }
 0x209   :  { %v1902_v54 = vmax.f32 %v1838_v53, 0.0  ;;  %v3183_v55 = vpop.f32.mrb[42].mxu1 }
 0x20a   :  { %v1841_v58 = vadd.f32 %v3183_v55, %v4341_v56  ;;  %v1682_v59 = vpop.f32.mrb[43].mxu1 }
 0x20b   :  { %v1840_v60 = vadd.f32 %v4341_v56, %v1682_v59  ;;  %3306 = vmatprep.mubr.f32.mxu0 %v1902_v54 }
 0x20c   :  { %3307 = vmatmul.mubr.f32.gmra.mrb[104].mxu0 %v1903_v57  ;;  %v1905_v34 = vmax.f32 %v1841_v58, 0.0 }
 0x20d   :  { %v1904_v61 = vmax.f32 %v1840_v60, 0.0  ;;  %v3186_v62 = vpop.f32.mrb[44].mxu1  ;;  %v4410_v60 = vld [vmem:[%s4740_s8] ss:$0 sm:$0xff] }
 0x20e   :  { %v1843_v63 = vadd.f32 %v3186_v62, %v4341_v56  ;;  %v1692_v0 = vpop.f32.mrb[45].mxu1 }
 0x20f   :  { %v1842_v1 = vadd.f32 %v4341_v56, %v1692_v0  ;;  %3309 = vmatprep.mubr.f32.mxu0 %v1904_v61 }
 0x210   :  { %3310 = vmatmul.mubr.f32.gmra.mrb[106].mxu0 %v1905_v34  ;;  %v1907_v4 = vmax.f32 %v1843_v63, 0.0 }
 0x211   :  { %v1906_v2 = vmax.f32 %v1842_v1, 0.0  ;;  %v3189_v3 = vpop.f32.mrb[46].mxu1 }
 0x212   :  { %v1845_v5 = vadd.f32 %v3189_v3, %v4341_v56  ;;  %v1702_v6 = vpop.f32.mrb[47].mxu1 }
 0x213   :  { %v1844_v7 = vadd.f32 %v4341_v56, %v1702_v6  ;;  %3312 = vmatprep.mubr.f32.mxu0 %v1906_v2 }
 0x214   :  { %3313 = vmatmul.mubr.f32.gmra.mrb[108].mxu0 %v1907_v4  ;;  %v1909_v10 = vmax.f32 %v1845_v5, 0.0 }
 0x215   :  { %v1908_v8 = vmax.f32 %v1844_v7, 0.0  ;;  %v3192_v9 = vpop.f32.mrb[48].mxu1 }
 0x216   :  { %v1847_v11 = vadd.f32 %v3192_v9, %v4341_v56  ;;  %v1712_v12 = vpop.f32.mrb[49].mxu1 }
 0x217   :  { %v1846_v13 = vadd.f32 %v4341_v56, %v1712_v12  ;;  %3315 = vmatprep.mubr.f32.mxu0 %v1908_v8 }
 0x218   :  { %3316 = vmatmul.mubr.f32.gmra.mrb[110].mxu0 %v1909_v10  ;;  %v1911_v16 = vmax.f32 %v1847_v11, 0.0 }
 0x219   :  { %v1910_v14 = vmax.f32 %v1846_v13, 0.0  ;;  %v3195_v15 = vpop.f32.mrb[50].mxu1 }
 0x21a   :  { %v1849_v17 = vadd.f32 %v3195_v15, %v4341_v56  ;;  %v1722_v18 = vpop.f32.mrb[51].mxu1 }
 0x21b   :  { %v1848_v19 = vadd.f32 %v4341_v56, %v1722_v18  ;;  %3318 = vmatprep.mubr.f32.mxu0 %v1910_v14 }
 0x21c   :  { %3319 = vmatmul.mubr.f32.gmra.mrb[112].mxu0 %v1911_v16  ;;  %v1913_v22 = vmax.f32 %v1849_v17, 0.0 }
 0x21d   :  { %v1912_v20 = vmax.f32 %v1848_v19, 0.0  ;;  %v3198_v21 = vpop.f32.mrb[52].mxu1 }
 0x21e   :  { %v1851_v23 = vadd.f32 %v3198_v21, %v4341_v56  ;;  %v1732_v24 = vpop.f32.mrb[53].mxu1 }
 0x21f   :  { %v1850_v25 = vadd.f32 %v4341_v56, %v1732_v24  ;;  %3321 = vmatprep.mubr.f32.mxu0 %v1912_v20 }
 0x220   :  { %3322 = vmatmul.mubr.f32.gmra.mrb[114].mxu0 %v1913_v22  ;;  %v1915_v28 = vmax.f32 %v1851_v23, 0.0 }
 0x221   :  { %v1914_v26 = vmax.f32 %v1850_v25, 0.0  ;;  %v3201_v27 = vpop.f32.mrb[54].mxu1 }
 0x222   :  { %v1853_v29 = vadd.f32 %v3201_v27, %v4341_v56  ;;  %v1742_v30 = vpop.f32.mrb[55].mxu1 }
 0x223   :  { %v1852_v31 = vadd.f32 %v4341_v56, %v1742_v30  ;;  %3324 = vmatprep.mubr.f32.mxu0 %v1914_v26 }
 0x224   :  { %3325 = vmatmul.mubr.f32.gmra.mrb[116].mxu0 %v1915_v28  ;;  %v1917_v35 = vmax.f32 %v1853_v29, 0.0 }
 0x225   :  { %v1916_v32 = vmax.f32 %v1852_v31, 0.0  ;;  %v3204_v33 = vpop.f32.mrb[56].mxu1 }
 0x226   :  { %v1855_v36 = vadd.f32 %v3204_v33, %v4341_v56  ;;  %v1752_v37 = vpop.f32.mrb[57].mxu1 }
 0x227   :  { %v1854_v38 = vadd.f32 %v4341_v56, %v1752_v37  ;;  %3327 = vmatprep.mubr.f32.mxu0 %v1916_v32 }
 0x228   :  { %3328 = vmatmul.mubr.f32.gmra.mrb[118].mxu0 %v1917_v35  ;;  %v1919_v41 = vmax.f32 %v1855_v36, 0.0 }
 0x229   :  { %v1918_v39 = vmax.f32 %v1854_v38, 0.0  ;;  %v3207_v40 = vpop.f32.mrb[58].mxu1 }
 0x22a   :  { %v1857_v42 = vadd.f32 %v3207_v40, %v4341_v56  ;;  %v1762_v43 = vpop.f32.mrb[59].mxu1 }
 0x22b   :  { %v1856_v44 = vadd.f32 %v4341_v56, %v1762_v43  ;;  %3330 = vmatprep.mubr.f32.mxu0 %v1918_v39 }
 0x22c   :  { %3331 = vmatmul.mubr.f32.gmra.mrb[120].mxu0 %v1919_v41  ;;  %v1921_v47 = vmax.f32 %v1857_v42, 0.0 }
 0x22d   :  { %v1920_v45 = vmax.f32 %v1856_v44, 0.0  ;;  %v3210_v46 = vpop.f32.mrb[60].mxu1 }
 0x22e   :  { %v1859_v48 = vadd.f32 %v3210_v46, %v4341_v56  ;;  %v1772_v49 = vpop.f32.mrb[61].mxu1 }
 0x22f   :  { %v1858_v50 = vadd.f32 %v4341_v56, %v1772_v49  ;;  %3333 = vmatprep.mubr.f32.mxu0 %v1920_v45 }
 0x230   :  { %3334 = vmatmul.mubr.f32.gmra.mrb[122].mxu0 %v1921_v47  ;;  %v1923_v53 = vmax.f32 %v1859_v48, 0.0 }
 0x231   :  { %v1922_v51 = vmax.f32 %v1858_v50, 0.0  ;;  %v3213_v52 = vpop.f32.mrb[62].mxu1 }
 0x232   :  { %v1861_v54 = vadd.f32 %v3213_v52, %v4341_v56  ;;  %v1782_v55 = vpop.f32.mrb[63].mxu1 }
 0x233   :  { %v1860_v57 = vadd.f32 %v4341_v56, %v1782_v55  ;;  %3336 = vmatprep.mubr.f32.mxu0 %v1922_v51 }
 0x234   :  { %3337 = vmatmul.mubr.f32.gmra.mrb[124].mxu0 %v1923_v53  ;;  %v1925_v59 = vmax.f32 %v1861_v54, 0.0 }
 0x235   :  { %v1924_v58 = vmax.f32 %v1860_v57, 0.0 }
 0x237   :  { %3339 = vmatprep.mubr.f32.mxu0 %v1924_v58 }
 0x238   :  { %3340 = vmatmul.mubr.f32.gmra.mrb[126].mxu0 %v1925_v59 }
 0x28f   :  { %v3248_v61 = vpop.f32.mrb[64].mxu0 }
 0x290   :  { %v2021_v62 = vadd.f32 %v3248_v61, %v4410_v60  ;;  %v2015_v34 = vpop.f32.mrb[65].mxu0 }
 0x291   :  { %v2016_v63 = vadd.f32 %v4410_v60, %v2015_v34 }
 0x292   :  { %3474 = vtanh.f32 %v2021_v62 }
 0x293   :  { %3476 = vtanh.f32 %v2016_v63  ;;  %v3251_v56 = vpop.f32.mrb[66].mxu0 }
 0x294   :  { %v2031_v0 = vadd.f32 %v3251_v56, %v4410_v60  ;;  %v2025_v1 = vpop.f32.mrb[67].mxu0 }
 0x295   :  { %v2026_v2 = vadd.f32 %v4410_v60, %v2025_v1 }
 0x296   :  { %3478 = vtanh.f32 %v2031_v0 }
 0x297   :  { %3480 = vtanh.f32 %v2026_v2  ;;  %v3254_v3 = vpop.f32.mrb[68].mxu0 }
 0x298   :  { %v2041_v4 = vadd.f32 %v3254_v3, %v4410_v60  ;;  %v2035_v5 = vpop.f32.mrb[69].mxu0 }
 0x299   :  { %v2036_v6 = vadd.f32 %v4410_v60, %v2035_v5 }
 0x29a   :  { %3482 = vtanh.f32 %v2041_v4 }
 0x29b   :  { %3484 = vtanh.f32 %v2036_v6  ;;  %v3257_v7 = vpop.f32.mrb[70].mxu0 }
 0x29c   :  { %v3475_v8 = vpop.eup %3474  ;;  %v2051_v9 = vadd.f32 %v3257_v7, %v4410_v60  ;;  %v2045_v10 = vpop.f32.mrb[71].mxu0 }
 0x29d   :  { %v3477_v11 = vpop.eup %3476  ;;  %2399 = vst.msk [vmem:[%s4741_s9 + $0x8] sm:$0xff] %vm828_vm1, %v3475_v8  ;;  %v2046_v12 = vadd.f32 %v4410_v60, %v2045_v10 }
 0x29e   :  { %2398 = vst.msk [vmem:[%s4741_s9] sm:$0xff] %vm828_vm1, %v3477_v11  ;;  %3486 = vtanh.f32 %v2051_v9 }
 0x29f   :  { %3488 = vtanh.f32 %v2046_v12  ;;  %v3260_v13 = vpop.f32.mrb[72].mxu0 }
 0x2a0   :  { %v3479_v14 = vpop.eup %3478  ;;  %v2061_v15 = vadd.f32 %v3260_v13, %v4410_v60  ;;  %v2055_v16 = vpop.f32.mrb[73].mxu0 }
 0x2a1   :  { %v3481_v17 = vpop.eup %3480  ;;  %2401 = vst.msk [vmem:[%s4741_s9 + $0x18] sm:$0xff] %vm828_vm1, %v3479_v14  ;;  %v2056_v18 = vadd.f32 %v4410_v60, %v2055_v16 }
 0x2a2   :  { %2400 = vst.msk [vmem:[%s4741_s9 + $0x10] sm:$0xff] %vm828_vm1, %v3481_v17  ;;  %3490 = vtanh.f32 %v2061_v15 }
 0x2a3   :  { %3492 = vtanh.f32 %v2056_v18  ;;  %v3263_v19 = vpop.f32.mrb[74].mxu0 }
 0x2a4   :  { %v3483_v20 = vpop.eup %3482  ;;  %v2071_v21 = vadd.f32 %v3263_v19, %v4410_v60  ;;  %v2065_v22 = vpop.f32.mrb[75].mxu0 }
 0x2a5   :  { %v3485_v23 = vpop.eup %3484  ;;  %2403 = vst.msk [vmem:[%s4741_s9 + $0x28] sm:$0xff] %vm828_vm1, %v3483_v20  ;;  %v2066_v24 = vadd.f32 %v4410_v60, %v2065_v22 }
 0x2a6   :  { %2402 = vst.msk [vmem:[%s4741_s9 + $0x20] sm:$0xff] %vm828_vm1, %v3485_v23  ;;  %3494 = vtanh.f32 %v2071_v21 }
 0x2a7   :  { %3496 = vtanh.f32 %v2066_v24  ;;  %v3266_v25 = vpop.f32.mrb[76].mxu0 }
 0x2a8   :  { %v3487_v26 = vpop.eup %3486  ;;  %v2081_v27 = vadd.f32 %v3266_v25, %v4410_v60  ;;  %v2075_v28 = vpop.f32.mrb[77].mxu0 }
 0x2a9   :  { %v3489_v29 = vpop.eup %3488  ;;  %2405 = vst.msk [vmem:[%s4741_s9 + $0x38] sm:$0xff] %vm828_vm1, %v3487_v26  ;;  %v2076_v30 = vadd.f32 %v4410_v60, %v2075_v28 }
 0x2aa   :  { %2404 = vst.msk [vmem:[%s4741_s9 + $0x30] sm:$0xff] %vm828_vm1, %v3489_v29  ;;  %3498 = vtanh.f32 %v2081_v27 }
 0x2ab   :  { %3500 = vtanh.f32 %v2076_v30  ;;  %v3269_v31 = vpop.f32.mrb[78].mxu0 }
 0x2ac   :  { %v3491_v32 = vpop.eup %3490  ;;  %v2091_v33 = vadd.f32 %v3269_v31, %v4410_v60  ;;  %v2085_v35 = vpop.f32.mrb[79].mxu0 }
 0x2ad   :  { %v3493_v36 = vpop.eup %3492  ;;  %2407 = vst.msk [vmem:[%s4741_s9 + $0x48] sm:$0xff] %vm828_vm1, %v3491_v32  ;;  %v2086_v37 = vadd.f32 %v4410_v60, %v2085_v35 }
 0x2ae   :  { %2406 = vst.msk [vmem:[%s4741_s9 + $0x40] sm:$0xff] %vm828_vm1, %v3493_v36  ;;  %3502 = vtanh.f32 %v2091_v33 }
 0x2af   :  { %3504 = vtanh.f32 %v2086_v37  ;;  %v3272_v38 = vpop.f32.mrb[80].mxu0 }
 0x2b0   :  { %v3495_v39 = vpop.eup %3494  ;;  %v2101_v40 = vadd.f32 %v3272_v38, %v4410_v60  ;;  %v2095_v41 = vpop.f32.mrb[81].mxu0 }
 0x2b1   :  { %v3497_v42 = vpop.eup %3496  ;;  %2409 = vst.msk [vmem:[%s4741_s9 + $0x58] sm:$0xff] %vm828_vm1, %v3495_v39  ;;  %v2096_v43 = vadd.f32 %v4410_v60, %v2095_v41 }
 0x2b2   :  { %2408 = vst.msk [vmem:[%s4741_s9 + $0x50] sm:$0xff] %vm828_vm1, %v3497_v42  ;;  %3506 = vtanh.f32 %v2101_v40 }
 0x2b3   :  { %3508 = vtanh.f32 %v2096_v43  ;;  %v3275_v44 = vpop.f32.mrb[82].mxu0 }
 0x2b4   :  { %v3499_v45 = vpop.eup %3498  ;;  %v2111_v46 = vadd.f32 %v3275_v44, %v4410_v60  ;;  %v2105_v47 = vpop.f32.mrb[83].mxu0 }
 0x2b5   :  { %v3501_v48 = vpop.eup %3500  ;;  %2411 = vst.msk [vmem:[%s4741_s9 + $0x68] sm:$0xff] %vm828_vm1, %v3499_v45  ;;  %v2106_v49 = vadd.f32 %v4410_v60, %v2105_v47 }
 0x2b6   :  { %2410 = vst.msk [vmem:[%s4741_s9 + $0x60] sm:$0xff] %vm828_vm1, %v3501_v48  ;;  %3510 = vtanh.f32 %v2111_v46 }
 0x2b7   :  { %3512 = vtanh.f32 %v2106_v49  ;;  %v3278_v50 = vpop.f32.mrb[84].mxu0 }
 0x2b8   :  { %v3503_v51 = vpop.eup %3502  ;;  %v2121_v52 = vadd.f32 %v3278_v50, %v4410_v60  ;;  %v2115_v53 = vpop.f32.mrb[85].mxu0 }
 0x2b9   :  { %v3505_v54 = vpop.eup %3504  ;;  %2413 = vst.msk [vmem:[%s4741_s9 + $0x78] sm:$0xff] %vm828_vm1, %v3503_v51  ;;  %v2116_v55 = vadd.f32 %v4410_v60, %v2115_v53 }
 0x2ba   :  { %2412 = vst.msk [vmem:[%s4741_s9 + $0x70] sm:$0xff] %vm828_vm1, %v3505_v54  ;;  %3514 = vtanh.f32 %v2121_v52 }
 0x2bb   :  { %3516 = vtanh.f32 %v2116_v55  ;;  %v3281_v57 = vpop.f32.mrb[86].mxu0 }
 0x2bc   :  { %v3507_v58 = vpop.eup %3506  ;;  %v2131_v59 = vadd.f32 %v3281_v57, %v4410_v60  ;;  %v2125_v61 = vpop.f32.mrb[87].mxu0 }
 0x2bd   :  { %v3509_v62 = vpop.eup %3508  ;;  %2415 = vst.msk [vmem:[%s4741_s9 + $0x88] sm:$0xff] %vm828_vm1, %v3507_v58  ;;  %v2126_v34 = vadd.f32 %v4410_v60, %v2125_v61 }
 0x2be   :  { %2414 = vst.msk [vmem:[%s4741_s9 + $0x80] sm:$0xff] %vm828_vm1, %v3509_v62  ;;  %3518 = vtanh.f32 %v2131_v59 }
 0x2bf   :  { %3520 = vtanh.f32 %v2126_v34  ;;  %v3284_v63 = vpop.f32.mrb[88].mxu0 }
 0x2c0   :  { %v3511_v56 = vpop.eup %3510  ;;  %v2141_v0 = vadd.f32 %v3284_v63, %v4410_v60  ;;  %v2135_v1 = vpop.f32.mrb[89].mxu0 }
 0x2c1   :  { %v3513_v2 = vpop.eup %3512  ;;  %2417 = vst.msk [vmem:[%s4741_s9 + $0x98] sm:$0xff] %vm828_vm1, %v3511_v56  ;;  %v2136_v3 = vadd.f32 %v4410_v60, %v2135_v1 }
 0x2c2   :  { %2416 = vst.msk [vmem:[%s4741_s9 + $0x90] sm:$0xff] %vm828_vm1, %v3513_v2  ;;  %3522 = vtanh.f32 %v2141_v0 }
 0x2c3   :  { %3524 = vtanh.f32 %v2136_v3  ;;  %v3287_v4 = vpop.f32.mrb[90].mxu0 }
 0x2c4   :  { %v3515_v5 = vpop.eup %3514  ;;  %v2151_v6 = vadd.f32 %v3287_v4, %v4410_v60  ;;  %v2145_v7 = vpop.f32.mrb[91].mxu0 }
 0x2c5   :  { %v3517_v8 = vpop.eup %3516  ;;  %2419 = vst.msk [vmem:[%s4741_s9 + $0xa8] sm:$0xff] %vm828_vm1, %v3515_v5  ;;  %v2146_v9 = vadd.f32 %v4410_v60, %v2145_v7 }
 0x2c6   :  { %2418 = vst.msk [vmem:[%s4741_s9 + $0xa0] sm:$0xff] %vm828_vm1, %v3517_v8  ;;  %3526 = vtanh.f32 %v2151_v6 }
 0x2c7   :  { %3528 = vtanh.f32 %v2146_v9  ;;  %v3290_v10 = vpop.f32.mrb[92].mxu0 }
 0x2c8   :  { %v3519_v11 = vpop.eup %3518  ;;  %v2161_v12 = vadd.f32 %v3290_v10, %v4410_v60  ;;  %v2155_v13 = vpop.f32.mrb[93].mxu0 }
 0x2c9   :  { %v3521_v14 = vpop.eup %3520  ;;  %2421 = vst.msk [vmem:[%s4741_s9 + $0xb8] sm:$0xff] %vm828_vm1, %v3519_v11  ;;  %v2156_v15 = vadd.f32 %v4410_v60, %v2155_v13 }
 0x2ca   :  { %2420 = vst.msk [vmem:[%s4741_s9 + $0xb0] sm:$0xff] %vm828_vm1, %v3521_v14  ;;  %3530 = vtanh.f32 %v2161_v12 }
 0x2cb   :  { %3532 = vtanh.f32 %v2156_v15  ;;  %v3293_v16 = vpop.f32.mrb[94].mxu0 }
 0x2cc   :  { %v3523_v17 = vpop.eup %3522  ;;  %v2171_v18 = vadd.f32 %v3293_v16, %v4410_v60  ;;  %v2165_v19 = vpop.f32.mrb[95].mxu0 }
 0x2cd   :  { %v3525_v20 = vpop.eup %3524  ;;  %2423 = vst.msk [vmem:[%s4741_s9 + $0xc8] sm:$0xff] %vm828_vm1, %v3523_v17  ;;  %v2166_v21 = vadd.f32 %v4410_v60, %v2165_v19 }
 0x2ce   :  { %2422 = vst.msk [vmem:[%s4741_s9 + $0xc0] sm:$0xff] %vm828_vm1, %v3525_v20  ;;  %3534 = vtanh.f32 %v2171_v18 }
 0x2cf   :  { %3536 = vtanh.f32 %v2166_v21  ;;  %v3296_v22 = vpop.f32.mrb[96].mxu0 }
 0x2d0   :  { %v3527_v23 = vpop.eup %3526  ;;  %v2181_v24 = vadd.f32 %v3296_v22, %v4410_v60  ;;  %v2175_v25 = vpop.f32.mrb[97].mxu0 }
 0x2d1   :  { %v3529_v26 = vpop.eup %3528  ;;  %2425 = vst.msk [vmem:[%s4741_s9 + $0xd8] sm:$0xff] %vm828_vm1, %v3527_v23  ;;  %v2176_v27 = vadd.f32 %v4410_v60, %v2175_v25 }
 0x2d2   :  { %2424 = vst.msk [vmem:[%s4741_s9 + $0xd0] sm:$0xff] %vm828_vm1, %v3529_v26  ;;  %3538 = vtanh.f32 %v2181_v24 }
 0x2d3   :  { %3540 = vtanh.f32 %v2176_v27  ;;  %v3299_v28 = vpop.f32.mrb[98].mxu0 }
 0x2d4   :  { %v3531_v29 = vpop.eup %3530  ;;  %v2191_v30 = vadd.f32 %v3299_v28, %v4410_v60  ;;  %v2185_v31 = vpop.f32.mrb[99].mxu0 }
 0x2d5   :  { %v3533_v32 = vpop.eup %3532  ;;  %2427 = vst.msk [vmem:[%s4741_s9 + $0xe8] sm:$0xff] %vm828_vm1, %v3531_v29  ;;  %v2186_v33 = vadd.f32 %v4410_v60, %v2185_v31 }
 0x2d6   :  { %2426 = vst.msk [vmem:[%s4741_s9 + $0xe0] sm:$0xff] %vm828_vm1, %v3533_v32  ;;  %3542 = vtanh.f32 %v2191_v30 }
 0x2d7   :  { %3544 = vtanh.f32 %v2186_v33  ;;  %v3302_v35 = vpop.f32.mrb[100].mxu0 }
 0x2d8   :  { %v3535_v36 = vpop.eup %3534  ;;  %v2201_v37 = vadd.f32 %v3302_v35, %v4410_v60  ;;  %v2195_v38 = vpop.f32.mrb[101].mxu0 }
 0x2d9   :  { %v3537_v39 = vpop.eup %3536  ;;  %2429 = vst.msk [vmem:[%s4741_s9 + $0xf8] sm:$0xff] %vm828_vm1, %v3535_v36  ;;  %v2196_v40 = vadd.f32 %v4410_v60, %v2195_v38 }
 0x2da   :  { %2428 = vst.msk [vmem:[%s4741_s9 + $0xf0] sm:$0xff] %vm828_vm1, %v3537_v39  ;;  %3546 = vtanh.f32 %v2201_v37 }
 0x2db   :  { %3548 = vtanh.f32 %v2196_v40  ;;  %v3305_v41 = vpop.f32.mrb[102].mxu0 }
 0x2dc   :  { %v3539_v42 = vpop.eup %3538  ;;  %v2211_v43 = vadd.f32 %v3305_v41, %v4410_v60  ;;  %v2205_v44 = vpop.f32.mrb[103].mxu0 }
 0x2dd   :  { %v3541_v45 = vpop.eup %3540  ;;  %2431 = vst.msk [vmem:[%s4741_s9 + $0x108] sm:$0xff] %vm828_vm1, %v3539_v42  ;;  %v2206_v46 = vadd.f32 %v4410_v60, %v2205_v44 }
 0x2de   :  { %2430 = vst.msk [vmem:[%s4741_s9 + $0x100] sm:$0xff] %vm828_vm1, %v3541_v45  ;;  %3550 = vtanh.f32 %v2211_v43 }
 0x2df   :  { %3552 = vtanh.f32 %v2206_v46  ;;  %v3308_v47 = vpop.f32.mrb[104].mxu0 }
 0x2e0   :  { %v3543_v48 = vpop.eup %3542  ;;  %v2221_v49 = vadd.f32 %v3308_v47, %v4410_v60  ;;  %v2215_v50 = vpop.f32.mrb[105].mxu0 }
 0x2e1   :  { %v3545_v51 = vpop.eup %3544  ;;  %2433 = vst.msk [vmem:[%s4741_s9 + $0x118] sm:$0xff] %vm828_vm1, %v3543_v48  ;;  %v2216_v52 = vadd.f32 %v4410_v60, %v2215_v50 }
 0x2e2   :  { %2432 = vst.msk [vmem:[%s4741_s9 + $0x110] sm:$0xff] %vm828_vm1, %v3545_v51  ;;  %3554 = vtanh.f32 %v2221_v49 }
 0x2e3   :  { %3556 = vtanh.f32 %v2216_v52  ;;  %v3311_v53 = vpop.f32.mrb[106].mxu0 }
 0x2e4   :  { %v3547_v54 = vpop.eup %3546  ;;  %v2231_v55 = vadd.f32 %v3311_v53, %v4410_v60  ;;  %v2225_v57 = vpop.f32.mrb[107].mxu0 }
 0x2e5   :  { %v3549_v58 = vpop.eup %3548  ;;  %2435 = vst.msk [vmem:[%s4741_s9 + $0x128] sm:$0xff] %vm828_vm1, %v3547_v54  ;;  %v2226_v59 = vadd.f32 %v4410_v60, %v2225_v57 }
 0x2e6   :  { %2434 = vst.msk [vmem:[%s4741_s9 + $0x120] sm:$0xff] %vm828_vm1, %v3549_v58  ;;  %3558 = vtanh.f32 %v2231_v55 }
 0x2e7   :  { %3560 = vtanh.f32 %v2226_v59  ;;  %v3314_v61 = vpop.f32.mrb[108].mxu0 }
 0x2e8   :  { %v3551_v62 = vpop.eup %3550  ;;  %v2241_v34 = vadd.f32 %v3314_v61, %v4410_v60  ;;  %v2235_v63 = vpop.f32.mrb[109].mxu0 }
 0x2e9   :  { %v3553_v56 = vpop.eup %3552  ;;  %2437 = vst.msk [vmem:[%s4741_s9 + $0x138] sm:$0xff] %vm828_vm1, %v3551_v62  ;;  %v2236_v0 = vadd.f32 %v4410_v60, %v2235_v63 }
 0x2ea   :  { %2436 = vst.msk [vmem:[%s4741_s9 + $0x130] sm:$0xff] %vm828_vm1, %v3553_v56  ;;  %3562 = vtanh.f32 %v2241_v34 }
 0x2eb   :  { %3564 = vtanh.f32 %v2236_v0  ;;  %v3317_v1 = vpop.f32.mrb[110].mxu0 }
 0x2ec   :  { %v3555_v2 = vpop.eup %3554  ;;  %v2251_v3 = vadd.f32 %v3317_v1, %v4410_v60  ;;  %v2245_v4 = vpop.f32.mrb[111].mxu0 }
 0x2ed   :  { %v3557_v5 = vpop.eup %3556  ;;  %2439 = vst.msk [vmem:[%s4741_s9 + $0x148] sm:$0xff] %vm828_vm1, %v3555_v2  ;;  %v2246_v6 = vadd.f32 %v4410_v60, %v2245_v4 }
 0x2ee   :  { %2438 = vst.msk [vmem:[%s4741_s9 + $0x140] sm:$0xff] %vm828_vm1, %v3557_v5  ;;  %3566 = vtanh.f32 %v2251_v3 }
 0x2ef   :  { %3568 = vtanh.f32 %v2246_v6  ;;  %v3320_v7 = vpop.f32.mrb[112].mxu0 }
 0x2f0   :  { %v3559_v8 = vpop.eup %3558  ;;  %v2261_v9 = vadd.f32 %v3320_v7, %v4410_v60  ;;  %v2255_v10 = vpop.f32.mrb[113].mxu0 }
 0x2f1   :  { %v3561_v11 = vpop.eup %3560  ;;  %2441 = vst.msk [vmem:[%s4741_s9 + $0x158] sm:$0xff] %vm828_vm1, %v3559_v8  ;;  %v2256_v12 = vadd.f32 %v4410_v60, %v2255_v10 }
 0x2f2   :  { %2440 = vst.msk [vmem:[%s4741_s9 + $0x150] sm:$0xff] %vm828_vm1, %v3561_v11  ;;  %3570 = vtanh.f32 %v2261_v9 }
 0x2f3   :  { %3572 = vtanh.f32 %v2256_v12  ;;  %v3323_v13 = vpop.f32.mrb[114].mxu0 }
 0x2f4   :  { %v3563_v14 = vpop.eup %3562  ;;  %v2271_v15 = vadd.f32 %v3323_v13, %v4410_v60  ;;  %v2265_v16 = vpop.f32.mrb[115].mxu0 }
 0x2f5   :  { %v3565_v17 = vpop.eup %3564  ;;  %2443 = vst.msk [vmem:[%s4741_s9 + $0x168] sm:$0xff] %vm828_vm1, %v3563_v14  ;;  %v2266_v18 = vadd.f32 %v4410_v60, %v2265_v16 }
 0x2f6   :  { %2442 = vst.msk [vmem:[%s4741_s9 + $0x160] sm:$0xff] %vm828_vm1, %v3565_v17  ;;  %3574 = vtanh.f32 %v2271_v15 }
 0x2f7   :  { %3576 = vtanh.f32 %v2266_v18  ;;  %v3326_v19 = vpop.f32.mrb[116].mxu0 }
 0x2f8   :  { %v3567_v20 = vpop.eup %3566  ;;  %v2281_v21 = vadd.f32 %v3326_v19, %v4410_v60  ;;  %v2275_v22 = vpop.f32.mrb[117].mxu0 }
 0x2f9   :  { %v3569_v23 = vpop.eup %3568  ;;  %2445 = vst.msk [vmem:[%s4741_s9 + $0x178] sm:$0xff] %vm828_vm1, %v3567_v20  ;;  %v2276_v24 = vadd.f32 %v4410_v60, %v2275_v22 }
 0x2fa   :  { %2444 = vst.msk [vmem:[%s4741_s9 + $0x170] sm:$0xff] %vm828_vm1, %v3569_v23  ;;  %3578 = vtanh.f32 %v2281_v21 }
 0x2fb   :  { %3580 = vtanh.f32 %v2276_v24  ;;  %v3329_v25 = vpop.f32.mrb[118].mxu0 }
 0x2fc   :  { %v3571_v26 = vpop.eup %3570  ;;  %v2291_v27 = vadd.f32 %v3329_v25, %v4410_v60  ;;  %v2285_v28 = vpop.f32.mrb[119].mxu0 }
 0x2fd   :  { %v3573_v29 = vpop.eup %3572  ;;  %2447 = vst.msk [vmem:[%s4741_s9 + $0x188] sm:$0xff] %vm828_vm1, %v3571_v26  ;;  %v2286_v30 = vadd.f32 %v4410_v60, %v2285_v28 }
 0x2fe   :  { %2446 = vst.msk [vmem:[%s4741_s9 + $0x180] sm:$0xff] %vm828_vm1, %v3573_v29  ;;  %3582 = vtanh.f32 %v2291_v27 }
 0x2ff   :  { %3584 = vtanh.f32 %v2286_v30  ;;  %v3332_v31 = vpop.f32.mrb[120].mxu0 }
 0x300   :  { %v3575_v32 = vpop.eup %3574  ;;  %v2301_v33 = vadd.f32 %v3332_v31, %v4410_v60  ;;  %v2295_v35 = vpop.f32.mrb[121].mxu0 }
 0x301   :  { %v3577_v36 = vpop.eup %3576  ;;  %2449 = vst.msk [vmem:[%s4741_s9 + $0x198] sm:$0xff] %vm828_vm1, %v3575_v32  ;;  %v2296_v37 = vadd.f32 %v4410_v60, %v2295_v35 }
 0x302   :  { %2448 = vst.msk [vmem:[%s4741_s9 + $0x190] sm:$0xff] %vm828_vm1, %v3577_v36  ;;  %3586 = vtanh.f32 %v2301_v33 }
 0x303   :  { %3588 = vtanh.f32 %v2296_v37  ;;  %v3335_v38 = vpop.f32.mrb[122].mxu0 }
 0x304   :  { %v3579_v39 = vpop.eup %3578  ;;  %v2311_v40 = vadd.f32 %v3335_v38, %v4410_v60  ;;  %v2305_v41 = vpop.f32.mrb[123].mxu0 }
 0x305   :  { %v3581_v42 = vpop.eup %3580  ;;  %2451 = vst.msk [vmem:[%s4741_s9 + $0x1a8] sm:$0xff] %vm828_vm1, %v3579_v39  ;;  %v2306_v43 = vadd.f32 %v4410_v60, %v2305_v41 }
 0x306   :  { %2450 = vst.msk [vmem:[%s4741_s9 + $0x1a0] sm:$0xff] %vm828_vm1, %v3581_v42  ;;  %3590 = vtanh.f32 %v2311_v40 }
 0x307   :  { %3592 = vtanh.f32 %v2306_v43  ;;  %v3338_v44 = vpop.f32.mrb[124].mxu0 }
 0x308   :  { %v3583_v45 = vpop.eup %3582  ;;  %v2321_v46 = vadd.f32 %v3338_v44, %v4410_v60  ;;  %v2315_v47 = vpop.f32.mrb[125].mxu0 }
 0x309   :  { %v3585_v48 = vpop.eup %3584  ;;  %2453 = vst.msk [vmem:[%s4741_s9 + $0x1b8] sm:$0xff] %vm828_vm1, %v3583_v45  ;;  %v2316_v49 = vadd.f32 %v4410_v60, %v2315_v47 }
 0x30a   :  { %2452 = vst.msk [vmem:[%s4741_s9 + $0x1b0] sm:$0xff] %vm828_vm1, %v3585_v48  ;;  %3594 = vtanh.f32 %v2321_v46 }
 0x30b   :  { %3596 = vtanh.f32 %v2316_v49  ;;  %v3341_v50 = vpop.f32.mrb[126].mxu0 }
 0x30c   :  { %v3587_v51 = vpop.eup %3586  ;;  %v2331_v52 = vadd.f32 %v3341_v50, %v4410_v60  ;;  %v2325_v53 = vpop.f32.mrb[127].mxu0 }
 0x30d   :  { %v3589_v54 = vpop.eup %3588  ;;  %2455 = vst.msk [vmem:[%s4741_s9 + $0x1c8] sm:$0xff] %vm828_vm1, %v3587_v51  ;;  %v2326_v55 = vadd.f32 %v4410_v60, %v2325_v53 }
 0x30e   :  { %2454 = vst.msk [vmem:[%s4741_s9 + $0x1c0] sm:$0xff] %vm828_vm1, %v3589_v54  ;;  %3598 = vtanh.f32 %v2331_v52 }
 0x30f   :  { %3600 = vtanh.f32 %v2326_v55 }
 0x310   :  { %v3591_v57 = vpop.eup %3590 }
 0x311   :  { %v3593_v58 = vpop.eup %3592  ;;  %2457 = vst.msk [vmem:[%s4741_s9 + $0x1d8] sm:$0xff] %vm828_vm1, %v3591_v57 }
 0x312   :  { %2456 = vst.msk [vmem:[%s4741_s9 + $0x1d0] sm:$0xff] %vm828_vm1, %v3593_v58 }
 0x314   :  { %v3595_v60 = vpop.eup %3594 }
 0x315   :  { %v3597_v59 = vpop.eup %3596  ;;  %2459 = vst.msk [vmem:[%s4741_s9 + $0x1e8] sm:$0xff] %vm828_vm1, %v3595_v60 }
 0x316   :  { %2458 = vst.msk [vmem:[%s4741_s9 + $0x1e0] sm:$0xff] %vm828_vm1, %v3597_v59 }
 0x318   :  { %v3599_v61 = vpop.eup %3598 }
 0x319   :  { %v3601_v62 = vpop.eup %3600  ;;  %2461 = vst.msk [vmem:[%s4741_s9 + $0x1f8] sm:$0xff] %vm828_vm1, %v3599_v61 }
 0x31a   :  { %2460 = vst.msk [vmem:[%s4741_s9 + $0x1f0] sm:$0xff] %vm828_vm1, %v3601_v62 }

</bundles_post_ra>
